<compile_context>
chip_gen: v5e
topology: v5e:2x2
jax: 0.10.0
libtpu: 0.0.40
codegen_flags: <defaults>
</compile_context>

<pallas_src>
import jax
import jax.numpy as jnp
from jax.experimental import pallas as pl
from jax.experimental.pallas import tpu as pltpu


def _round_up(x, m):
    return ((x + m - 1) // m) * m


def _cosine_sim_kernel(x1_ref, x2_ref, inv_b_ref, o_ref):
    # x1_ref: (tm, D) tile of x1      (native dtype)
    # x2_ref: (tn, D) tile of x2      (native dtype)
    # inv_b_ref: (1, tn) precomputed 1/||x2||  (f32)
    # o_ref: (tm, tn) output tile
    a = x1_ref[...]
    b = x2_ref[...]

    # MXU matmul, contraction over D on both operands (no b.T materialized).
    dots = jax.lax.dot_general(
        a, b,
        dimension_numbers=(((1,), (1,)), ((), ())),
        preferred_element_type=jnp.float32,
    )  # (tm, tn), f32 accumulation

    # Per-row inverse norm of the x1 tile (tiny (tm, 1) vector, exact path).
    a32 = a.astype(jnp.float32)
    inv_a = 1.0 / jnp.sqrt(jnp.sum(a32 * a32, axis=1, keepdims=True))  # (tm, 1)

    # Two broadcast multiplies instead of a full-tile norm outer product + div.
    o_ref[...] = (dots * inv_a * inv_b_ref[...]).astype(o_ref.dtype)


def cosine_similarity(x1, x2, *, tm=256, tn=256):
    M, D = x1.shape
    N, D2 = x2.shape
    assert D == D2, "feature dims must match"

    # Hoisted: x2 inverse row norms, computed once in f32 (O(N*D) work).
    x2_f32 = x2.astype(jnp.float32)
    inv_b = (1.0 / jnp.sqrt(jnp.sum(x2_f32 * x2_f32, axis=1)))[None, :]  # (1, N)

    # Effective tile sizes: sublane-aligned M tile, lane-dense (x128) N tile.
    tm_eff = min(tm, _round_up(M, 8))
    tn_eff = min(tn, _round_up(N, 128))
    m_pad = _round_up(M, tm_eff)
    n_pad = _round_up(N, tn_eff)

    x1_p = jnp.pad(x1, ((0, m_pad - M), (0, 0))) if m_pad != M else x1
    x2_p = jnp.pad(x2, ((0, n_pad - N), (0, 0))) if n_pad != N else x2
    inv_b_p = jnp.pad(inv_b, ((0, 0), (0, n_pad - N))) if n_pad != N else inv_b

    out = pl.pallas_call(
        _cosine_sim_kernel,
        out_shape=jax.ShapeDtypeStruct((m_pad, n_pad), jnp.float32),
        grid_spec=pltpu.PrefetchScalarGridSpec(
            num_scalar_prefetch=0,
            grid=(m_pad // tm_eff, n_pad // tn_eff),
            in_specs=[
                pl.BlockSpec((tm_eff, D), lambda i, j: (i, 0)),   # x1 M-tile
                pl.BlockSpec((tn_eff, D), lambda i, j: (j, 0)),   # x2 N-tile
                pl.BlockSpec((1, tn_eff), lambda i, j: (0, j)),   # 1/||x2|| tile
            ],
            out_specs=pl.BlockSpec((tm_eff, tn_eff), lambda i, j: (i, j)),
        ),
        compiler_params=pltpu.CompilerParams(
            dimension_semantics=("parallel", "parallel"),
        ),
    )(x1_p, x2_p, inv_b_p)

    return out[:M, :N]


def _reference(x1, x2):
    dots = jnp.dot(x1, x2.T, precision=jax.lax.Precision.HIGHEST)
    n1 = jnp.linalg.norm(x1, axis=1, keepdims=True)
    n2 = jnp.linalg.norm(x2, axis=1, keepdims=True)
    return dots * (1.0 / (n1 @ n2.T))


if __name__ == "__main__":
    key = jax.random.PRNGKey(0)
    k1, k2 = jax.random.split(key)

    # Tile-aligned case (exercises the 256x256 lane-dense output tiles).
    M, N, D = 256, 256, 64
    x1 = jax.random.normal(k1, (M, D), dtype=jnp.float32)
    x2 = jax.random.normal(k2, (N, D), dtype=jnp.float32)
    out = jax.block_until_ready(cosine_similarity(x1, x2))
    ref = _reference(x1, x2)
    assert out.shape == (M, N)
    assert jnp.allclose(out, ref, atol=1e-4, rtol=1e-4), "aligned case mismatch"

    # Unaligned case (exercises clamped tiles + padding path).
    M2, N2, D2 = 200, 120, 48
    y1 = jax.random.normal(k1, (M2, D2), dtype=jnp.float32)
    y2 = jax.random.normal(k2, (N2, D2), dtype=jnp.float32)
    out2 = jax.block_until_ready(cosine_similarity(y1, y2))
    ref2 = _reference(y1, y2)
    assert out2.shape == (M2, N2)
    assert jnp.allclose(out2, ref2, atol=1e-4, rtol=1e-4), "unaligned case mismatch"

    print("KERNEL_OK")
</pallas_src>

<mosaic_0001>
module attributes {stable_mosaic.version = 11 : i64} {
  func.func @_cosine_sim_kernel(%arg0: i32, %arg1: i32, %arg2: memref<256x64xf32, #tpu.memory_space<vmem>>, %arg3: memref<256x64xf32, #tpu.memory_space<vmem>>, %arg4: memref<1x256xf32, #tpu.memory_space<vmem>>, %arg5: memref<256x256xf32, #tpu.memory_space<vmem>>) attributes {dimension_semantics = [#tpu.dimension_semantics<parallel>, #tpu.dimension_semantics<parallel>], iteration_bounds = array<i64: 1, 1>, scalar_prefetch = 0 : i64, scratch_operands = 0 : i64, tpu.core_type = #tpu.core_type<tc>, window_params = [{transform_indices = @transform_0, window_bounds = array<i64: 256, 64>}, {transform_indices = @transform_1, window_bounds = array<i64: 256, 64>}, {transform_indices = @transform_2, window_bounds = array<i64: 1, 256>}, {transform_indices = @transform_3, window_bounds = array<i64: 256, 256>}]} {
    %c0 = arith.constant 0 : index
    %c0_0 = arith.constant 0 : index
    %0 = vector.load %arg2[%c0, %c0_0] : memref<256x64xf32, #tpu.memory_space<vmem>>, vector<256x64xf32>
    %c0_1 = arith.constant 0 : index
    %c0_2 = arith.constant 0 : index
    %1 = vector.load %arg3[%c0_1, %c0_2] : memref<256x64xf32, #tpu.memory_space<vmem>>, vector<256x64xf32>
    %cst = arith.constant dense<0.000000e+00> : vector<256x256xf32>
    %2 = tpu.matmul %0, %1, %cst {dimension_numbers = #tpu.dot_dimension_numbers<[1], [1], [0], [0], [0, 0, 1, 0], [], []>} : vector<256x64xf32>, vector<256x64xf32>, vector<256x256xf32> -> vector<256x256xf32>
    %3 = arith.mulf %0, %0 : vector<256x64xf32>
    %cst_3 = arith.constant dense<0.000000e+00> : vector<256xf32>
    %4 = vector.multi_reduction <add>, %3, %cst_3 [1] : vector<256x64xf32> to vector<256xf32>
    %5 = vector.shape_cast %4 : vector<256xf32> to vector<256x1xf32>
    %6 = math.sqrt %5 : vector<256x1xf32>
    %cst_4 = arith.constant 1.000000e+00 : f32
    %7 = vector.broadcast %cst_4 : f32 to vector<256x1xf32>
    %8 = arith.divf %7, %6 : vector<256x1xf32>
    %9 = vector.broadcast %8 : vector<256x1xf32> to vector<256x256xf32>
    %10 = arith.mulf %2, %9 : vector<256x256xf32>
    %c0_5 = arith.constant 0 : index
    %c0_6 = arith.constant 0 : index
    %11 = vector.load %arg4[%c0_5, %c0_6] : memref<1x256xf32, #tpu.memory_space<vmem>>, vector<1x256xf32>
    %12 = vector.broadcast %11 : vector<1x256xf32> to vector<256x256xf32>
    %13 = arith.mulf %10, %12 : vector<256x256xf32>
    %c0_7 = arith.constant 0 : index
    %c0_8 = arith.constant 0 : index
    %14 = vector.load %arg5[%c0_7, %c0_8] : memref<256x256xf32, #tpu.memory_space<vmem>>, vector<256x256xf32>
    tpu.vector_store %arg5[%c0_7, %c0_8], %13 {strides = array<i32>} : memref<256x256xf32, #tpu.memory_space<vmem>>, vector<256x256xf32>,
    return
  }
  func.func @transform_0(%arg0: i32, %arg1: i32) -> (i32, i32) {
    %c0_i32 = arith.constant 0 : i32
    %c0_i32_0 = arith.constant 0 : i32
    return %arg0, %c0_i32 : i32, i32
  }
  func.func @transform_1(%arg0: i32, %arg1: i32) -> (i32, i32) {
    %c0_i32 = arith.constant 0 : i32
    %c0_i32_0 = arith.constant 0 : i32
    return %arg1, %c0_i32 : i32, i32
  }
  func.func @transform_2(%arg0: i32, %arg1: i32) -> (i32, i32) {
    %c0_i32 = arith.constant 0 : i32
    %c0_i32_0 = arith.constant 0 : i32
    return %c0_i32, %arg1 : i32, i32
  }
  func.func @transform_3(%arg0: i32, %arg1: i32) -> (i32, i32) {
    %c0_i32 = arith.constant 0 : i32
    return %arg0, %arg1 : i32, i32
  }
}

</mosaic_0001>

<bundles_post_ra>
// kernel: tpu_custom_call.1
= control target key start
LH: loop header
LB: loop body
LE: loop exit
PB: predicated region body
PF: predicated region fallthrough
CT: control target
= control target key end

     0   :  { %vm79_vm0 = vcmask 523264   ;;  %s3834_s0 = inlined_call_operand.vmem [shape: f32[256,64], index: 0, kind: input, shape index: {}]   ;;  %s3835_s1 = inlined_call_operand.vmem [shape: f32[256,64], index: 1, kind: input, shape index: {}]   ;;  %s3836_s2 = inlined_call_operand.vmem [shape: f32[1,256], index: 2, kind: input, shape index: {}]   ;;  %s3837_s3 = inlined_call_operand.hbm [shape: f32[256,256], index: 3, kind: output, shape index: {}]  }
   0x1   :  { %v62_v0 = vld [vmem:[%s3835_s1 + $0x78] sm:$0xff]  ;;  %v2023_v2 = vld [vmem:[%s3834_s0 + $0x10] sm:$0xff]  ;;  %v2037_v5 = vld [vmem:[%s3834_s0 + $0x20] sm:$0xff] }
   0x2   :  { %v78_v1 = vld [vmem:[%s3835_s1 + $0xf8] sm:$0xff]  ;;  %1706 = vmatpush.xpose.msk.msra.mxu0 %vm79_vm0, %v62_v0  ;;  %1802 = vmatpush.xpose.msk.msra.mxu2 %vm79_vm0, %v62_v0  ;;  %v500_v3 = vmul.f32 %v2023_v2, %v2023_v2  ;;  %v61_v4 = vld [vmem:[%s3835_s1 + $0x70] sm:$0xff]  ;;  %v2042_v6 = vld [vmem:[%s3834_s0] sm:$0xff]  ;;  %v502_v9 = vmul.f32 %v2037_v5, %v2037_v5 }
   0x3   :  { %1754 = vmatpush.xpose.msk.msra.mxu1 %vm79_vm0, %v78_v1  ;;  %1818 = vmatpush.xpose.msk.msra.mxu3 %vm79_vm0, %v78_v1  ;;  %v77_v8 = vld [vmem:[%s3835_s1 + $0xf0] sm:$0xff]  ;;  %v498_v10 = vmul.f32 %v2042_v6, %v2042_v6  ;;  %v2055_v11 = vld [vmem:[%s3834_s0 + $0x18] sm:$0xff]  ;;  %v2066_v15 = vld [vmem:[%s3834_s0 + $0x28] sm:$0xff] }
   0x4   :  { %v536_v7 = vsel %vm79_vm0, %v500_v3, 0.0  ;;  %v542_v12 = vsel %vm79_vm0, %v502_v9, 0.0  ;;  %v501_v14 = vmul.f32 %v2055_v11, %v2055_v11  ;;  %v2071_v16 = vld [vmem:[%s3834_s0 + $0x8] sm:$0xff]  ;;  %v503_v19 = vmul.f32 %v2066_v15, %v2066_v15  ;;  %v59_v22 = vld [vmem:[%s3835_s1 + $0x60] sm:$0xff]  ;;  %v2096_v23 = vld [vmem:[%s3834_s0 + $0x38] sm:$0xff] }
   0x5   :  { %537 = vadd.xlane.f32.xlu1 %v536_v7  ;;  %v530_v13 = vsel %vm79_vm0, %v498_v10, 0.0  ;;  %v60_v17 = vld [vmem:[%s3835_s1 + $0x68] sm:$0xff]  ;;  %543 = vadd.xlane.f32.xlu2 %v542_v12  ;;  %v499_v20 = vmul.f32 %v2071_v16, %v2071_v16  ;;  %v75_v24 = vld [vmem:[%s3835_s1 + $0xe0] sm:$0xff]  ;;  %v505_v27 = vmul.f32 %v2096_v23, %v2096_v23  ;;  %v2115_v29 = vld [vmem:[%s3834_s0 + $0x30] sm:$0xff] }
   0x6   :  { %1707 = vmatpush.xpose.msk.msra.mxu0 %vm79_vm0, %v61_v4  ;;  %1803 = vmatpush.xpose.msk.msra.mxu2 %vm79_vm0, %v61_v4  ;;  %v76_v18 = vld [vmem:[%s3835_s1 + $0xe8] sm:$0xff]  ;;  %v539_v21 = vsel %vm79_vm0, %v501_v14, 0.0  ;;  %v545_v25 = vsel %vm79_vm0, %v503_v19, 0.0  ;;  %v2110_v28 = vld [vmem:[%s3834_s0 + $0x40] sm:$0xff] }
   0x7   :  { %1755 = vmatpush.xpose.msk.msra.mxu1 %vm79_vm0, %v77_v8  ;;  %1819 = vmatpush.xpose.msk.msra.mxu3 %vm79_vm0, %v77_v8  ;;  %v533_v26 = vsel %vm79_vm0, %v499_v20, 0.0 }
   0x8   :  { %531 = vadd.xlane.f32.xlu0 %v530_v13 }
   0xa   :  { %1708 = vmatpush.xpose.msk.msra.mxu0 %vm79_vm0, %v60_v17  ;;  %1804 = vmatpush.xpose.msk.msra.mxu2 %vm79_vm0, %v60_v17 }
   0xb   :  { %1756 = vmatpush.xpose.msk.msra.mxu1 %vm79_vm0, %v76_v18  ;;  %1820 = vmatpush.xpose.msk.msra.mxu3 %vm79_vm0, %v76_v18 }
   0xd   :  { %540 = vadd.xlane.f32.xlu1 %v539_v21 }
   0xe   :  { %1709 = vmatpush.xpose.msk.msra.mxu0 %vm79_vm0, %v59_v22  ;;  %1805 = vmatpush.xpose.msk.msra.mxu2 %vm79_vm0, %v59_v22 }
   0xf   :  { %8 = vsyncpa [#allocation3], 0  ;;  %1757 = vmatpush.xpose.msk.msra.mxu1 %vm79_vm0, %v75_v24  ;;  %1821 = vmatpush.xpose.msk.msra.mxu3 %vm79_vm0, %v75_v24  ;;  %v58_v30 = vld [vmem:[%s3835_s1 + $0x58] sm:$0xff]  ;;  %v506_v32 = vmul.f32 %v2110_v28, %v2110_v28  ;;  %v504_v33 = vmul.f32 %v2115_v29, %v2115_v29  ;;  %v551_v34 = vsel %vm79_vm0, %v505_v27, 0.0  ;;  %v57_v35 = vld [vmem:[%s3835_s1 + $0x50] sm:$0xff]  ;;  %s1694_s8 = sshll.u32 %s3837_s3, 4  ;;  %s1695_s8 = int_to_ptr.hbm [resolvable:$true] %s1694_s8 }
  0x10   :  { %v74_v31 = vld [vmem:[%s3835_s1 + $0xd8] sm:$0xff]  ;;  %546 = vadd.xlane.f32.xlu2 %v545_v25  ;;  %534 = vadd.xlane.f32.xlu0 %v533_v26  ;;  %v2140_v36 = vld [vmem:[%s3834_s0 + $0x50] sm:$0xff]  ;;  %v2159_v42 = vld [vmem:[%s3834_s0 + $0x48] sm:$0xff]  ;;  %s1992_s9 = smov 256   ;;  %s1993_s10 = smov 16  }
  0x11   :  { %v73_v37 = vld [vmem:[%s3835_s1 + $0xd0] sm:$0xff]  ;;  %v554_v38 = vsel %vm79_vm0, %v506_v32, 0.0  ;;  %v548_v39 = vsel %vm79_vm0, %v504_v33, 0.0  ;;  %v508_v40 = vmul.f32 %v2140_v36, %v2140_v36  ;;  %v2154_v41 = vld [vmem:[%s3834_s0 + $0x58] sm:$0xff]  ;;  %v56_v43 = vld [vmem:[%s3835_s1 + $0x48] sm:$0xff]  ;;  %v507_v46 = vmul.f32 %v2159_v42, %v2159_v42 }
  0x12   :  { %1710 = vmatpush.xpose.msk.msra.mxu0 %vm79_vm0, %v58_v30  ;;  %1806 = vmatpush.xpose.msk.msra.mxu2 %vm79_vm0, %v58_v30  ;;  %v72_v44 = vld [vmem:[%s3835_s1 + $0xc8] sm:$0xff]  ;;  %v509_v45 = vmul.f32 %v2154_v41, %v2154_v41  ;;  %v55_v48 = vld [vmem:[%s3835_s1 + $0x40] sm:$0xff]  ;;  %v2198_v54 = vld [vmem:[%s3834_s0 + $0x70] sm:$0xff] }
  0x13   :  { %1758 = vmatpush.xpose.msk.msra.mxu1 %vm79_vm0, %v74_v31  ;;  %1822 = vmatpush.xpose.msk.msra.mxu3 %vm79_vm0, %v74_v31  ;;  %v560_v47 = vsel %vm79_vm0, %v508_v40, 0.0  ;;  %v2184_v49 = vld [vmem:[%s3834_s0 + $0x68] sm:$0xff]  ;;  %v71_v50 = vld [vmem:[%s3835_s1 + $0xc0] sm:$0xff]  ;;  %v557_v52 = vsel %vm79_vm0, %v507_v46, 0.0  ;;  %v54_v56 = vld [vmem:[%s3835_s1 + $0x38] sm:$0xff]  ;;  %v512_v58 = vmul.f32 %v2198_v54, %v2198_v54 }
  0x14   :  { %v563_v51 = vsel %vm79_vm0, %v509_v45, 0.0  ;;  %v511_v53 = vmul.f32 %v2184_v49, %v2184_v49  ;;  %v2203_v55 = vld [vmem:[%s3834_s0 + $0x60] sm:$0xff]  ;;  %v70_v57 = vld [vmem:[%s3835_s1 + $0xb8] sm:$0xff]  ;;  %v53_v61 = vld [vmem:[%s3835_s1 + $0x30] sm:$0xff] }
  0x15   :  { %552 = vadd.xlane.f32.xlu1 %v551_v34  ;;  %v510_v59 = vmul.f32 %v2203_v55, %v2203_v55  ;;  %v2228_v62 = vld [vmem:[%s3834_s0 + $0x80] sm:$0xff]  ;;  %v69_v63 = vld [vmem:[%s3835_s1 + $0xb0] sm:$0xff]  ;;  %v572_v0 = vsel %vm79_vm0, %v512_v58, 0.0  ;;  %v2242_v4 = vld [vmem:[%s3834_s0 + $0x88] sm:$0xff] }
  0x16   :  { %1711 = vmatpush.xpose.msk.msra.mxu0 %vm79_vm0, %v57_v35  ;;  %1807 = vmatpush.xpose.msk.msra.mxu2 %vm79_vm0, %v57_v35  ;;  %v569_v60 = vsel %vm79_vm0, %v511_v53, 0.0  ;;  %v514_v3 = vmul.f32 %v2228_v62, %v2228_v62  ;;  %v2247_v7 = vld [vmem:[%s3834_s0 + $0x78] sm:$0xff]  ;;  %v52_v8 = vld [vmem:[%s3835_s1 + $0x28] sm:$0xff]  ;;  %v515_v10 = vmul.f32 %v2242_v4, %v2242_v4  ;;  %v51_v14 = vld [vmem:[%s3835_s1 + $0x20] sm:$0xff] }
  0x17   :  { %1759 = vmatpush.xpose.msk.msra.mxu1 %vm79_vm0, %v73_v37  ;;  %1823 = vmatpush.xpose.msk.msra.mxu3 %vm79_vm0, %v73_v37  ;;  %v566_v1 = vsel %vm79_vm0, %v510_v59, 0.0  ;;  %v68_v9 = vld [vmem:[%s3835_s1 + $0xa8] sm:$0xff]  ;;  %v513_v12 = vmul.f32 %v2247_v7, %v2247_v7  ;;  %v2272_v17 = vld [vmem:[%s3834_s0 + $0x98] sm:$0xff]  ;;  %v67_v18 = vld [vmem:[%s3835_s1 + $0xa0] sm:$0xff] }
  0x18   :  { %555 = vadd.xlane.f32.xlu2 %v554_v38  ;;  %549 = vadd.xlane.f32.xlu0 %v548_v39  ;;  %v578_v13 = vsel %vm79_vm0, %v514_v3, 0.0  ;;  %v581_v19 = vsel %vm79_vm0, %v515_v10, 0.0  ;;  %v2284_v21 = vld [vmem:[%s3834_s0 + $0x90] sm:$0xff]  ;;  %v517_v22 = vmul.f32 %v2272_v17, %v2272_v17  ;;  %v2291_v24 = vld [vmem:[%s3834_s0 + $0xa0] sm:$0xff]  ;;  %v50_v25 = vld [vmem:[%s3835_s1 + $0x18] sm:$0xff] }
  0x19   :  { %v575_v20 = vsel %vm79_vm0, %v513_v12, 0.0  ;;  %v66_v26 = vld [vmem:[%s3835_s1 + $0x98] sm:$0xff]  ;;  %v516_v27 = vmul.f32 %v2284_v21, %v2284_v21  ;;  %v518_v30 = vmul.f32 %v2291_v24, %v2291_v24  ;;  %v49_v32 = vld [vmem:[%s3835_s1 + $0x10] sm:$0xff]  ;;  %v2323_v37 = vld [vmem:[%s3834_s0 + $0xa8] sm:$0xff] }
  0x1a   :  { %1712 = vmatpush.xpose.msk.msra.mxu0 %vm79_vm0, %v56_v43  ;;  %1808 = vmatpush.xpose.msk.msra.mxu2 %vm79_vm0, %v56_v43  ;;  %v587_v31 = vsel %vm79_vm0, %v517_v22, 0.0  ;;  %v65_v33 = vld [vmem:[%s3835_s1 + $0x90] sm:$0xff]  ;;  %v48_v38 = vld [vmem:[%s3835_s1 + $0x8] sm:$0xff]  ;;  %v519_v43 = vmul.f32 %v2323_v37, %v2323_v37  ;;  %v47_v45 = vld [vmem:[%s3835_s1] sm:$0xff] }
  0x1b   :  { %1760 = vmatpush.xpose.msk.msra.mxu1 %vm79_vm0, %v72_v44  ;;  %1824 = vmatpush.xpose.msk.msra.mxu3 %vm79_vm0, %v72_v44  ;;  %v584_v34 = vsel %vm79_vm0, %v516_v27, 0.0  ;;  %v590_v35 = vsel %vm79_vm0, %v518_v30, 0.0  ;;  %v64_v39 = vld [vmem:[%s3835_s1 + $0x88] sm:$0xff]  ;;  %v2336_v40 = vld [vmem:[%s3834_s0 + $0xb0] sm:$0xff]  ;;  %v2377_v53 = vld [vmem:[%s3834_s0 + $0xc0] sm:$0xff] }
  0x1c   :  { %v520_v44 = vmul.f32 %v2336_v40, %v2336_v40  ;;  %v2409_v59 = vld [vmem:[%s3834_s0 + $0xd0] sm:$0xff] }
  0x1d   :  { %561 = vadd.xlane.f32.xlu1 %v560_v47  ;;  %v63_v47 = vld [vmem:[%s3835_s1 + $0x80] sm:$0xff] }
  0x1e   :  { %1713 = vmatpush.xpose.msk.msra.mxu0 %vm79_vm0, %v55_v48  ;;  %1809 = vmatpush.xpose.msk.msra.mxu2 %vm79_vm0, %v55_v48  ;;  %v596_v46 = vsel %vm79_vm0, %v520_v44, 0.0  ;;  %v593_v48 = vsel %vm79_vm0, %v519_v43, 0.0 }
  0x1f   :  { %1761 = vmatpush.xpose.msk.msra.mxu1 %vm79_vm0, %v71_v50  ;;  %1825 = vmatpush.xpose.msk.msra.mxu3 %vm79_vm0, %v71_v50  ;;  %v2361_v50 = vld [vmem:[%s3834_s0 + $0xb8] sm:$0xff] }
  0x20   :  { %564 = vadd.xlane.f32.xlu2 %v563_v51  ;;  %558 = vadd.xlane.f32.xlu0 %v557_v52  ;;  %v521_v51 = vmul.f32 %v2361_v50, %v2361_v50 }
  0x22   :  { %1714 = vmatpush.xpose.msk.msra.mxu0 %vm79_vm0, %v54_v56  ;;  %1810 = vmatpush.xpose.msk.msra.mxu2 %vm79_vm0, %v54_v56  ;;  %v599_v52 = vsel %vm79_vm0, %v521_v51, 0.0 }
  0x23   :  { %1762 = vmatpush.xpose.msk.msra.mxu1 %vm79_vm0, %v70_v57  ;;  %1826 = vmatpush.xpose.msk.msra.mxu3 %vm79_vm0, %v70_v57  ;;  %v2393_v57 = vld [vmem:[%s3834_s0 + $0xc8] sm:$0xff] }
  0x25   :  { %570 = vadd.xlane.f32.xlu1 %v569_v60  ;;  %v2414_v60 = vld [vmem:[%s3834_s0 + $0xe0] sm:$0xff] }
  0x26   :  { %1715 = vmatpush.xpose.msk.msra.mxu0 %vm79_vm0, %v53_v61  ;;  %1811 = vmatpush.xpose.msk.msra.mxu2 %vm79_vm0, %v53_v61  ;;  %v524_v61 = vmul.f32 %v2409_v59, %v2409_v59 }
  0x27   :  { %1763 = vmatpush.xpose.msk.msra.mxu1 %vm79_vm0, %v69_v63  ;;  %1827 = vmatpush.xpose.msk.msra.mxu3 %vm79_vm0, %v69_v63 }
  0x28   :  { %573 = vadd.xlane.f32.xlu2 %v572_v0  ;;  %567 = vadd.xlane.f32.xlu0 %v566_v1  ;;  %v608_v0 = vsel %vm79_vm0, %v524_v61, 0.0 }
  0x2a   :  { %1716 = vmatpush.xpose.msk.msra.mxu0 %vm79_vm0, %v52_v8  ;;  %1812 = vmatpush.xpose.msk.msra.mxu2 %vm79_vm0, %v52_v8  ;;  %v2451_v8 = vld [vmem:[%s3834_s0 + $0xf0] sm:$0xff] }
  0x2b   :  { %1764 = vmatpush.xpose.msk.msra.mxu1 %vm79_vm0, %v68_v9  ;;  %1828 = vmatpush.xpose.msk.msra.mxu3 %vm79_vm0, %v68_v9  ;;  %v528_v12 = vmul.f32 %v2451_v8, %v2451_v8 }
  0x2d   :  { %579 = vadd.xlane.f32.xlu1 %v578_v13 }
  0x2e   :  { %1717 = vmatpush.xpose.msk.msra.mxu0 %vm79_vm0, %v51_v14  ;;  %1813 = vmatpush.xpose.msk.msra.mxu2 %vm79_vm0, %v51_v14 }
  0x2f   :  { %1765 = vmatpush.xpose.msk.msra.mxu1 %vm79_vm0, %v67_v18  ;;  %1829 = vmatpush.xpose.msk.msra.mxu3 %vm79_vm0, %v67_v18 }
  0x30   :  { %582 = vadd.xlane.f32.xlu2 %v581_v19  ;;  %576 = vadd.xlane.f32.xlu0 %v575_v20 }
  0x32   :  { %1718 = vmatpush.xpose.msk.msra.mxu0 %vm79_vm0, %v50_v25  ;;  %1814 = vmatpush.xpose.msk.msra.mxu2 %vm79_vm0, %v50_v25 }
  0x33   :  { %1766 = vmatpush.xpose.msk.msra.mxu1 %vm79_vm0, %v66_v26  ;;  %1830 = vmatpush.xpose.msk.msra.mxu3 %vm79_vm0, %v66_v26 }
  0x35   :  { %588 = vadd.xlane.f32.xlu1 %v587_v31 }
  0x36   :  { %1719 = vmatpush.xpose.msk.msra.mxu0 %vm79_vm0, %v49_v32  ;;  %1815 = vmatpush.xpose.msk.msra.mxu2 %vm79_vm0, %v49_v32 }
  0x37   :  { %1767 = vmatpush.xpose.msk.msra.mxu1 %vm79_vm0, %v65_v33  ;;  %1831 = vmatpush.xpose.msk.msra.mxu3 %vm79_vm0, %v65_v33 }
  0x38   :  { %585 = vadd.xlane.f32.xlu0 %v584_v34  ;;  %591 = vadd.xlane.f32.xlu2 %v590_v35 }
  0x3a   :  { %1720 = vmatpush.xpose.msk.msra.mxu0 %vm79_vm0, %v48_v38  ;;  %1816 = vmatpush.xpose.msk.msra.mxu2 %vm79_vm0, %v48_v38 }
  0x3b   :  { %1768 = vmatpush.xpose.msk.msra.mxu1 %vm79_vm0, %v64_v39  ;;  %1832 = vmatpush.xpose.msk.msra.mxu3 %vm79_vm0, %v64_v39 }
  0x3d   :  { %597 = vadd.xlane.f32.xlu1 %v596_v46 }
  0x3e   :  { %1721 = vmatpush.xpose.msk.msra.mxu0 %vm79_vm0, %v47_v45  ;;  %1817 = vmatpush.xpose.msk.msra.mxu2 %vm79_vm0, %v47_v45 }
  0x3f   :  { %1769 = vmatpush.xpose.msk.msra.mxu1 %vm79_vm0, %v63_v47  ;;  %1833 = vmatpush.xpose.msk.msra.mxu3 %vm79_vm0, %v63_v47 }
  0x40   :  { %594 = vadd.xlane.f32.xlu0 %v593_v48  ;;  %600 = vadd.xlane.f32.xlu2 %v599_v52 }
  0x41   :  { %1722 = vmatmul.msk.f32.vlgmr.msra.gmra.mxu0 %vm79_vm0, %v2042_v6  ;;  %1738 = vmatmul.msk.f32.vlgmr.msra.gmra.mxu2 %vm79_vm0, %v2228_v62 }
  0x42   :  { %1770 = vmatmul.msk.f32.vlgmr.msra.gmra.mxu1 %vm79_vm0, %v2042_v6  ;;  %1786 = vmatmul.msk.f32.vlgmr.msra.gmra.mxu3 %vm79_vm0, %v2228_v62  ;;  %v522_v6 = vmul.f32 %v2377_v53, %v2377_v53  ;;  %v526_v62 = vmul.f32 %v2414_v60, %v2414_v60 }
  0x44   :  { %v602_v56 = vsel %vm79_vm0, %v522_v6, 0.0  ;;  %v614_v1 = vsel %vm79_vm0, %v526_v62, 0.0 }
  0x48   :  { %603 = vadd.xlane.f32.xlu0 %v602_v56  ;;  %609 = vadd.xlane.f32.xlu2 %v608_v0 }
  0x49   :  { %1723 = vmatmul.msk.f32.gmra.mxu0 %vm79_vm0, %v2071_v16  ;;  %1739 = vmatmul.msk.f32.gmra.mxu2 %vm79_vm0, %v2242_v4 }
  0x4a   :  { %1771 = vmatmul.msk.f32.gmra.mxu1 %vm79_vm0, %v2071_v16  ;;  %1787 = vmatmul.msk.f32.gmra.mxu3 %vm79_vm0, %v2242_v4  ;;  %v523_v16 = vmul.f32 %v2393_v57, %v2393_v57  ;;  %v2441_v4 = vld [vmem:[%s3834_s0 + $0xe8] sm:$0xff] }
  0x4b   :  { %v527_v9 = vmul.f32 %v2441_v4, %v2441_v4 }
  0x4c   :  { %v605_v58 = vsel %vm79_vm0, %v523_v16, 0.0 }
  0x4d   :  { %606 = vadd.xlane.f32.xlu1 %v605_v58  ;;  %v617_v13 = vsel %vm79_vm0, %v527_v9, 0.0 }
  0x50   :  { %618 = vadd.xlane.f32.xlu2 %v617_v13 }
  0x51   :  { %1724 = vmatmul.msk.f32.gmra.mxu0 %vm79_vm0, %v2023_v2  ;;  %1740 = vmatmul.msk.f32.gmra.mxu2 %vm79_vm0, %v2284_v21 }
  0x52   :  { %1772 = vmatmul.msk.f32.gmra.mxu1 %vm79_vm0, %v2023_v2  ;;  %1788 = vmatmul.msk.f32.gmra.mxu3 %vm79_vm0, %v2284_v21  ;;  %v2419_v2 = vld [vmem:[%s3834_s0 + $0xd8] sm:$0xff] }
  0x53   :  { %v525_v63 = vmul.f32 %v2419_v2, %v2419_v2 }
  0x55   :  { %v611_v3 = vsel %vm79_vm0, %v525_v63, 0.0  ;;  %615 = vadd.xlane.f32.xlu1 %v614_v1 }
  0x56   :  { %612 = vadd.xlane.f32.xlu0 %v611_v3 }
  0x59   :  { %1725 = vmatmul.msk.f32.gmra.mxu0 %vm79_vm0, %v2055_v11  ;;  %1741 = vmatmul.msk.f32.gmra.mxu2 %vm79_vm0, %v2272_v17 }
  0x5a   :  { %1773 = vmatmul.msk.f32.gmra.mxu1 %vm79_vm0, %v2055_v11  ;;  %1789 = vmatmul.msk.f32.gmra.mxu3 %vm79_vm0, %v2272_v17  ;;  %v2446_v11 = vld [vmem:[%s3834_s0 + $0xf8] sm:$0xff]  ;;  %v620_v17 = vsel %vm79_vm0, %v528_v12, 0.0 }
  0x5b   :  { %v529_v10 = vmul.f32 %v2446_v11, %v2446_v11 }
  0x5d   :  { %v623_v14 = vsel %vm79_vm0, %v529_v10, 0.0 }
  0x5e   :  { %624 = vadd.xlane.f32.xlu1 %v623_v14  ;;  %621 = vadd.xlane.f32.xlu0 %v620_v17 }
  0x61   :  { %1726 = vmatmul.msk.f32.gmra.mxu0 %vm79_vm0, %v2037_v5  ;;  %1742 = vmatmul.msk.f32.gmra.mxu2 %vm79_vm0, %v2291_v24 }
  0x62   :  { %1774 = vmatmul.msk.f32.gmra.mxu1 %vm79_vm0, %v2037_v5  ;;  %1790 = vmatmul.msk.f32.gmra.mxu3 %vm79_vm0, %v2291_v24 }
  0x69   :  { %1727 = vmatmul.msk.f32.gmra.mxu0 %vm79_vm0, %v2066_v15  ;;  %1743 = vmatmul.msk.f32.gmra.mxu2 %vm79_vm0, %v2323_v37 }
  0x6a   :  { %1775 = vmatmul.msk.f32.gmra.mxu1 %vm79_vm0, %v2066_v15  ;;  %1791 = vmatmul.msk.f32.gmra.mxu3 %vm79_vm0, %v2323_v37 }
  0x71   :  { %1728 = vmatmul.msk.f32.gmra.mxu0 %vm79_vm0, %v2115_v29  ;;  %1744 = vmatmul.msk.f32.gmra.mxu2 %vm79_vm0, %v2336_v40 }
  0x72   :  { %1776 = vmatmul.msk.f32.gmra.mxu1 %vm79_vm0, %v2115_v29  ;;  %1792 = vmatmul.msk.f32.gmra.mxu3 %vm79_vm0, %v2336_v40 }
  0x78   :  { %v2486_v5 = vpop.xlane.xlu1 %537  ;;  %v2496_v15 = vpop.xlane.xlu2 %543 }
  0x79   :  { %1729 = vmatmul.msk.f32.gmra.mxu0 %vm79_vm0, %v2096_v23  ;;  %1745 = vmatmul.msk.f32.gmra.mxu2 %vm79_vm0, %v2361_v50  ;;  %vm657_vm14 = vcmp.eq.f32.partialorder %v2486_v5, inf }
  0x7a   :  { %1777 = vmatmul.msk.f32.gmra.mxu1 %vm79_vm0, %v2096_v23  ;;  %1793 = vmatmul.msk.f32.gmra.mxu3 %vm79_vm0, %v2361_v50 }
  0x7b   :  { %v2498_v29 = vpop.xlane.xlu0 %531 }
  0x7c   :  { %1837 = vrsqrt.f32 %v2498_v29  ;;  %vm633_vm1 = vcmp.eq.f32.partialorder %v2498_v29, inf  ;;  %vm635_vm2 = vcmp.eq.f32.partialorder %v2498_v29, 0.0  ;;  %v636_v13 = vand.u32 2147483648, %v2498_v29 }
  0x7d   :  { %1839 = vrsqrt.f32 %v2486_v5 }
  0x7e   :  { %1841 = vrsqrt.f32 %v2496_v15 }
  0x80   :  { %v2503_v18 = vpop.xlane.xlu1 %540 }
  0x81   :  { %1843 = vrsqrt.f32 %v2503_v18  ;;  %1730 = vmatmul.msk.f32.gmra.mxu0 %vm79_vm0, %v2110_v28  ;;  %1746 = vmatmul.msk.f32.gmra.mxu2 %vm79_vm0, %v2377_v53 }
  0x82   :  { %1778 = vmatmul.msk.f32.gmra.mxu1 %vm79_vm0, %v2110_v28  ;;  %1794 = vmatmul.msk.f32.gmra.mxu3 %vm79_vm0, %v2377_v53  ;;  %v1838_v23 = vpop.eup %1837 }
  0x83   :  { %v2514_v19 = vpop.xlane.xlu2 %546  ;;  %v2516_v20 = vpop.xlane.xlu0 %534  ;;  %v627_v22 = vmul.f32 %v1838_v23, %v2498_v29 }
  0x84   :  { %v2518_v21 = vpop.eup %1839  ;;  %1845 = vrsqrt.f32 %v2514_v19  ;;  %vm645_vm3 = vcmp.eq.f32.partialorder %v2516_v20, inf  ;;  %vm647_vm6 = vcmp.eq.f32.partialorder %v2516_v20, 0.0 }
  0x85   :  { %1847 = vrsqrt.f32 %v2516_v20  ;;  %v2523_v24 = vpop.eup %1841  ;;  %v628_v25 = vmul.f32 %v1838_v23, %v627_v22  ;;  %v651_v26 = vmul.f32 %v2518_v21, %v2486_v5 }
  0x86   :  { %v675_v31 = vmul.f32 %v2523_v24, %v2496_v15 }
  0x87   :  { %v2525_v28 = vpop.eup %1843  ;;  %v629_v27 = vmul.f32 0.5, %v628_v25  ;;  %v652_v37 = vmul.f32 %v2518_v21, %v651_v26 }
  0x88   :  { %v2529_v30 = vpop.xlane.xlu1 %552  ;;  %v663_v34 = vmul.f32 %v2525_v28, %v2503_v18 }
  0x89   :  { %1849 = vrsqrt.f32 %v2529_v30  ;;  %1731 = vmatmul.msk.f32.gmra.mxu0 %vm79_vm0, %v2159_v42  ;;  %1747 = vmatmul.msk.f32.gmra.mxu2 %vm79_vm0, %v2393_v57  ;;  %v630_v33 = vsub.f32 1.5, %v629_v27  ;;  %v653_v48 = vmul.f32 0.5, %v652_v37 }
  0x8a   :  { %v2538_v32 = vpop.eup %1845  ;;  %1779 = vmatmul.msk.f32.gmra.mxu1 %vm79_vm0, %v2159_v42  ;;  %1795 = vmatmul.msk.f32.gmra.mxu3 %vm79_vm0, %v2393_v57  ;;  %v676_v42 = vmul.f32 %v2523_v24, %v675_v31  ;;  %v664_v45 = vmul.f32 %v2525_v28, %v663_v34 }
  0x8b   :  { %v2546_v35 = vpop.eup %1847  ;;  %v687_v38 = vmul.f32 %v2538_v32, %v2514_v19  ;;  %v2551_v39 = vpop.xlane.xlu2 %555  ;;  %v631_v43 = vmul.f32 %v1838_v23, %v630_v33  ;;  %v654_v62 = vsub.f32 1.5, %v653_v48 }
  0x8c   :  { %v2553_v40 = vpop.xlane.xlu0 %549  ;;  %v639_v44 = vmul.f32 %v2546_v35, %v2516_v20  ;;  %1851 = vrsqrt.f32 %v2551_v39  ;;  %v677_v6 = vmul.f32 0.5, %v676_v42  ;;  %v665_v57 = vmul.f32 0.5, %v664_v45 }
  0x8d   :  { %1853 = vrsqrt.f32 %v2553_v40  ;;  %v688_v46 = vmul.f32 %v2538_v32, %v687_v38  ;;  %v632_v50 = vmul.f32 %v631_v43, %v2498_v29 }
  0x8e   :  { %v640_v51 = vmul.f32 %v2546_v35, %v639_v44  ;;  %v666_v14 = vsub.f32 1.5, %v665_v57 }
  0x8f   :  { %v1850_v47 = vpop.eup %1849  ;;  %v689_v16 = vmul.f32 0.5, %v688_v46  ;;  %v634_v9 = vsel %vm633_vm1, %v2498_v29, %v632_v50  ;;  %v655_v29 = vmul.f32 %v2518_v21, %v654_v62 }
  0x90   :  { %v711_v52 = vmul.f32 %v1850_v47, %v2529_v30  ;;  %v2565_v53 = vpop.xlane.xlu1 %561  ;;  %v641_v63 = vmul.f32 0.5, %v640_v51  ;;  %v2598_v27 = vsel %vm635_vm2, %v636_v13, %v634_v9  ;;  %v667_v44 = vmul.f32 %v2525_v28, %v666_v14 }
  0x91   :  { %1855 = vrsqrt.f32 %v2565_v53  ;;  %1732 = vmatmul.msk.f32.gmra.mxu0 %vm79_vm0, %v2140_v36  ;;  %1748 = vmatmul.msk.f32.gmra.mxu2 %vm79_vm0, %v2409_v59  ;;  %v690_v17 = vsub.f32 1.5, %v689_v16  ;;  %vm1015_vm4 = vweird.f32 %v2598_v27 }
  0x92   :  { %v2572_v56 = vpop.eup %1851  ;;  %v712_v58 = vmul.f32 %v1850_v47, %v711_v52  ;;  %1780 = vmatmul.msk.f32.gmra.mxu1 %vm79_vm0, %v2140_v36  ;;  %1796 = vmatmul.msk.f32.gmra.mxu3 %vm79_vm0, %v2409_v59  ;;  %v678_v59 = vsub.f32 1.5, %v677_v6  ;;  %v642_v25 = vsub.f32 1.5, %v641_v63  ;;  %v2644_v57 = vmul.f32 %v667_v44, %v2503_v18 }
  0x93   :  { %v2579_v61 = vpop.eup %1853  ;;  %v723_v0 = vmul.f32 %v2572_v56, %v2551_v39  ;;  %v2583_v1 = vpop.xlane.xlu2 %564  ;;  %v691_v42 = vmul.f32 %v2538_v32, %v690_v17 }
  0x94   :  { %3842 = vst [vmem:[#allocation5_spill] sm:$0xff] %v2583_v1  ;;  %v2585_v3 = vpop.xlane.xlu0 %558  ;;  %v713_v10 = vmul.f32 0.5, %v712_v58  ;;  %v699_v36 = vmul.f32 %v2579_v61, %v2553_v40  ;;  %1857 = vrsqrt.f32 %v2583_v1  ;;  %v679_v37 = vmul.f32 %v2523_v24, %v678_v59 }
  0x95   :  { %v724_v12 = vmul.f32 %v2572_v56, %v723_v0  ;;  %1859 = vrsqrt.f32 %v2585_v3  ;;  %v643_v24 = vmul.f32 %v2546_v35, %v642_v25  ;;  %v2647_v16 = vmul.f32 %v691_v42, %v2514_v19 }
  0x96   :  { %v700_v23 = vmul.f32 %v2579_v61, %v699_v36  ;;  %v714_v26 = vsub.f32 1.5, %v713_v10  ;;  %1861 = vrcp.f32 %v2598_v27  ;;  %v2641_v6 = vmul.f32 %v679_v37, %v2496_v15 }
  0x97   :  { %v2596_v22 = vpop.eup %1855  ;;  %v725_v31 = vmul.f32 0.5, %v724_v12  ;;  %v644_v63 = vmul.f32 %v643_v24, %v2516_v20 }
  0x98   :  { %v747_v33 = vmul.f32 %v2596_v22, %v2565_v53  ;;  %v2602_v34 = vpop.xlane.xlu1 %570  ;;  %v701_v38 = vmul.f32 0.5, %v700_v23  ;;  %v715_v46 = vmul.f32 %v1850_v47, %v714_v26 }
  0x99   :  { %3843 = vst [vmem:[#allocation6_spill] sm:$0xff] %v2602_v34  ;;  %1863 = vrsqrt.f32 %v2602_v34  ;;  %1733 = vmatmul.msk.f32.gmra.mxu0 %vm79_vm0, %v2154_v41  ;;  %1749 = vmatmul.msk.f32.gmra.mxu2 %vm79_vm0, %v2419_v2  ;;  %v726_v32 = vsub.f32 1.5, %v725_v31 }
  0x9a   :  { %v2612_v43 = vpop.eup %1857  ;;  %v748_v45 = vmul.f32 %v2596_v22, %v747_v33  ;;  %1781 = vmatmul.msk.f32.gmra.mxu1 %vm79_vm0, %v2154_v41  ;;  %1797 = vmatmul.msk.f32.gmra.mxu3 %vm79_vm0, %v2419_v2  ;;  %v2634_v2 = vmul.f32 %v655_v29, %v2486_v5  ;;  %v702_v52 = vsub.f32 1.5, %v701_v38  ;;  %v2654_v0 = vmul.f32 %v715_v46, %v2529_v30 }
  0x9b   :  { %v2621_v21 = vpop.eup %1859  ;;  %v759_v48 = vmul.f32 %v2612_v43, %v2583_v1  ;;  %v2626_v50 = vpop.xlane.xlu2 %573  ;;  %v727_v36 = vmul.f32 %v2572_v56, %v726_v32  ;;  %v1021_v46 = vand.u32 2147483648, %v2598_v27 }
  0x9c   :  { %v2628_v28 = vpop.xlane.xlu0 %567  ;;  %v749_v51 = vmul.f32 0.5, %v748_v45  ;;  %v735_v41 = vmul.f32 %v2621_v21, %v2585_v3  ;;  %1865 = vrsqrt.f32 %v2626_v50  ;;  %v2638_v47 = vpop.eup %1861  ;;  %v703_v14 = vmul.f32 %v2579_v61, %v702_v52 }
  0x9d   :  { %v760_v35 = vmul.f32 %v2612_v43, %v759_v48  ;;  %1867 = vrsqrt.f32 %v2628_v28  ;;  %v1011_v10 = vmul.f32 %v2638_v47, %v2598_v27  ;;  %v648_v61 = vand.u32 2147483648, %v2516_v20 }
  0x9e   :  { %v736_v58 = vmul.f32 %v2621_v21, %v735_v41  ;;  %v750_v59 = vsub.f32 1.5, %v749_v51  ;;  %vm1016_vm5 = vweird.f32 %v2638_v47  ;;  %v2698_v48 = vmul.f32 %v727_v36, %v2551_v39 }
  0x9f   :  { %v2650_v62 = vpop.eup %1863  ;;  %v761_v9 = vmul.f32 0.5, %v760_v35  ;;  %v1012_v56 = vsub.f32 1.0, %v1011_v10  ;;  %v2706_v41 = vmul.f32 %v703_v14, %v2553_v40  ;;  %vm2723_vm7 = vmor %vm1015_vm4, %vm1016_vm5 }
  0xa0   :  { %v783_v12 = vmul.f32 %v2650_v62, %v2602_v34  ;;  %v2661_v13 = vpop.xlane.xlu1 %579  ;;  %v737_v17 = vmul.f32 0.5, %v736_v58 }
  0xa1   :  { %1869 = vrsqrt.f32 %v2661_v13  ;;  %1734 = vmatmul.msk.f32.gmra.mxu0 %vm79_vm0, %v2203_v55  ;;  %1750 = vmatmul.msk.f32.gmra.mxu2 %vm79_vm0, %v2414_v60  ;;  %v762_v25 = vsub.f32 1.5, %v761_v9  ;;  %v1013_v38 = vmul.f32 %v2638_v47, %v1012_v56  ;;  %v1554_v9 = vld [vmem:[%s3836_s2] sm:$0x3]  ;;  %vm825_vm9 = vcmp.eq.f32.partialorder %v2661_v13, inf  ;;  %s1991_s2 = smov [#allocation2]  }
  0xa2   :  { %v2670_v23 = vpop.eup %1865  ;;  %v784_v26 = vmul.f32 %v2650_v62, %v783_v12  ;;  %1782 = vmatmul.msk.f32.gmra.mxu1 %vm79_vm0, %v2203_v55  ;;  %1798 = vmatmul.msk.f32.gmra.mxu3 %vm79_vm0, %v2414_v60  ;;  %v1019_v55 = vand.u32 2147483647, %v2598_v27  ;;  %v751_v60 = vmul.f32 %v2596_v22, %v750_v59  ;;  %v738_v45 = vsub.f32 1.5, %v737_v17  ;;  %s1692_s5 = sshll.u32 %s1991_s2, 4  ;;  %s1693_s5 = int_to_ptr.vmem [resolvable:$true] %s1692_s5 }
  0xa3   :  { %v2679_v31 = vpop.eup %1867  ;;  %v795_v33 = vmul.f32 %v2670_v23, %v2626_v50  ;;  %v2683_v29 = vpop.xlane.xlu2 %582  ;;  %v763_v32 = vmul.f32 %v2612_v43, %v762_v25  ;;  %v646_v22 = vsel %vm645_vm3, %v2516_v20, %v644_v63  ;;  %v1014_v58 = vadd.f32 %v2638_v47, %v1013_v38 }
  0xa4   :  { %v2685_v37 = vpop.xlane.xlu0 %576  ;;  %v785_v44 = vmul.f32 0.5, %v784_v26  ;;  %v771_v42 = vmul.f32 %v2679_v31, %v2628_v28  ;;  %1871 = vrsqrt.f32 %v2683_v29  ;;  %v2714_v43 = vmul.f32 %v751_v60, %v2565_v53 }
  0xa5   :  { %v796_v24 = vmul.f32 %v2670_v23, %v795_v33  ;;  %1873 = vrsqrt.f32 %v2685_v37  ;;  %vm2727_vm8 = vcmp.eq.f32.partialorder %v1019_v55, 8.507059e+37  ;;  %v739_v14 = vmul.f32 %v2621_v21, %v738_v45 }
  0xa6   :  { %v786_v52 = vsub.f32 1.5, %v785_v44  ;;  %v772_v35 = vmul.f32 %v2679_v31, %v771_v42  ;;  %3844 = vst [vmem:[#allocation7_spill] sm:$0xff] %v2714_v43  ;;  %v1022_v17 = vor.u32 1.1754944e-38, %v1021_v46  ;;  %v2739_v27 = vsel %vm647_vm6, %v648_v61, %v646_v22 }
  0xa7   :  { %v1870_v51 = vpop.eup %1869  ;;  %v797_v10 = vmul.f32 0.5, %v796_v24  ;;  %v2742_v25 = vmul.f32 %v763_v32, %v2583_v1  ;;  %v2748_v21 = vperm.slane %v1554_v9, 0  ;;  %v2771_v24 = vperm.slane %v1554_v9, 1 }
  0xa8   :  { %v819_v63 = vmul.f32 %v1870_v51, %v2661_v13  ;;  %v2717_v36 = vpop.xlane.xlu1 %588  ;;  %v787_v20 = vmul.f32 %v2650_v62, %v786_v52  ;;  %v2754_v61 = vmul.f32 0.5, %v772_v35  ;;  %v2768_v62 = vmul.f32 %v739_v14, %v2585_v3 }
  0xa9   :  { %1735 = vmatmul.msk.f32.gmra.mxu0 %vm79_vm0, %v2184_v49  ;;  %1751 = vmatmul.msk.f32.gmra.mxu2 %vm79_vm0, %v2441_v4  ;;  %1875 = vrsqrt.f32 %v2717_v36  ;;  %3849 = vst [vmem:[#allocation8_spill] sm:$0xff] %v2742_v25  ;;  %vm827_vm10 = vcmp.eq.f32.partialorder %v2661_v13, 0.0  ;;  %vm837_vm11 = vcmp.eq.f32.partialorder %v2683_v29, inf  ;;  %vm839_vm12 = vcmp.eq.f32.partialorder %v2683_v29, 0.0 }
  0xaa   :  { %v1872_v56 = vpop.eup %1871  ;;  %v820_v26 = vmul.f32 %v1870_v51, %v819_v63  ;;  %1783 = vmatmul.msk.f32.gmra.mxu1 %vm79_vm0, %v2184_v49  ;;  %1799 = vmatmul.msk.f32.gmra.mxu3 %vm79_vm0, %v2441_v4  ;;  %1877 = vrcp.f32 %v2739_v27  ;;  %v1018_v49 = vsel %vm2723_vm7, %v2638_v47, %v1014_v58  ;;  %v798_v4 = vsub.f32 1.5, %v797_v10 }
  0xab   :  { %v2751_v33 = vpop.eup %1873  ;;  %v831_v38 = vmul.f32 %v1872_v56, %v2683_v29  ;;  %v2759_v60 = vpop.xlane.xlu2 %591  ;;  %v2775_v32 = vsel %vm2727_vm8, %v1022_v17, %v1018_v49  ;;  %v2780_v22 = vmul.f32 %v787_v20, %v2602_v34  ;;  %v828_v58 = vand.u32 2147483648, %v2661_v13 }
  0xac   :  { %v2757_v55 = vpop.xlane.xlu0 %585  ;;  %v821_v44 = vmul.f32 0.5, %v820_v26  ;;  %v807_v42 = vmul.f32 %v2751_v33, %v2685_v37  ;;  %v2787_v10 = vmul.f32 %v2670_v23, %v798_v4  ;;  %v774_v63 = vsub.f32 1.5, %v2754_v61 }
  0xad   :  { %1879 = vrsqrt.f32 %v2757_v55  ;;  %v832_v45 = vmul.f32 %v1872_v56, %v831_v38  ;;  %3850 = vst [vmem:[#allocation9_spill] sm:$0xff] %v2780_v22  ;;  %v1034_v23 = vand.u32 2147483647, %v2739_v27  ;;  %v1036_v20 = vand.u32 2147483648, %v2739_v27 }
  0xae   :  { %1881 = vrsqrt.f32 %v2759_v60  ;;  %v822_v46 = vsub.f32 1.5, %v821_v44  ;;  %v808_v35 = vmul.f32 %v2751_v33, %v807_v42  ;;  %v840_v49 = vand.u32 2147483648, %v2683_v29 }
  0xaf   :  { %v1876_v47 = vpop.eup %1875  ;;  %v833_v52 = vmul.f32 0.5, %v832_v45  ;;  %vm1030_vm13 = vweird.f32 %v2739_v27  ;;  %vm2846_vm15 = vcmp.eq.f32.partialorder %v1034_v23, 8.507059e+37  ;;  %vm659_vm6 = vcmp.eq.f32.partialorder %v2486_v5, 0.0 }
  0xb0   :  { %v2784_v9 = vpop.eup %1877  ;;  %v823_v59 = vmul.f32 %v1870_v51, %v822_v46  ;;  %v855_v12 = vmul.f32 %v1876_v47, %v2717_v36  ;;  %v2791_v14 = vpop.xlane.xlu1 %597  ;;  %v809_v42 = vmul.f32 0.5, %v808_v35 }
  0xb1   :  { %v834_v17 = vsub.f32 1.5, %v833_v52  ;;  %1736 = vmatmul.msk.f32.gmra.mxu0 %vm79_vm0, %v2198_v54  ;;  %1752 = vmatmul.msk.f32.gmra.mxu2 %vm79_vm0, %v2451_v8  ;;  %v1026_v26 = vmul.f32 %v2784_v9, %v2739_v27  ;;  %1883 = vrsqrt.f32 %v2791_v14  ;;  %vm1031_vm2 = vweird.f32 %v2784_v9 }
  0xb2   :  { %v824_v51 = vmul.f32 %v823_v59, %v2661_v13  ;;  %1784 = vmatmul.msk.f32.gmra.mxu1 %vm79_vm0, %v2198_v54  ;;  %1800 = vmatmul.msk.f32.gmra.mxu3 %vm79_vm0, %v2451_v8  ;;  %v856_v38 = vmul.f32 %v1876_v47, %v855_v12  ;;  %vm2870_vm3 = vmor %vm1030_vm13, %vm1031_vm2  ;;  %vm851_vm13 = vcmp.eq.f32.partialorder %v2757_v55, 0.0 }
  0xb3   :  { %v1880_v61 = vpop.eup %1879  ;;  %v835_v44 = vmul.f32 %v1872_v56, %v834_v17  ;;  %v1027_v59 = vsub.f32 1.0, %v1026_v26 }
  0xb4   :  { %v2808_v4 = vpop.eup %1881  ;;  %v843_v45 = vmul.f32 %v1880_v61, %v2757_v55  ;;  %v2811_v46 = vpop.xlane.xlu0 %594  ;;  %v857_v52 = vmul.f32 0.5, %v856_v38  ;;  %v826_v8 = vsel %vm825_vm9, %v2661_v13, %v824_v51  ;;  %v810_v38 = vsub.f32 1.5, %v809_v42 }
  0xb5   :  { %v867_v54 = vmul.f32 %v2808_v4, %v2759_v60  ;;  %v836_v12 = vmul.f32 %v835_v44, %v2683_v29  ;;  %v829_v56 = vsel %vm827_vm10, %v828_v58, %v826_v8  ;;  %1885 = vrsqrt.f32 %v2811_v46 }
  0xb6   :  { %v844_v22 = vmul.f32 %v1880_v61, %v843_v45  ;;  %v858_v35 = vsub.f32 1.5, %v857_v52  ;;  %1887 = vrcp.f32 %v829_v56  ;;  %v1259_v51 = vand.u32 2147483647, %v829_v56 }
  0xb7   :  { %v868_v17 = vmul.f32 %v2808_v4, %v867_v54  ;;  %v1261_v44 = vand.u32 2147483648, %v829_v56  ;;  %v838_v13 = vsel %vm837_vm11, %v2683_v29, %v836_v12  ;;  %v2830_v58 = vpop.eup %1883  ;;  %v1028_v42 = vmul.f32 %v2784_v9, %v1027_v59 }
  0xb8   :  { %v845_v34 = vmul.f32 0.5, %v844_v22  ;;  %v859_v26 = vmul.f32 %v1876_v47, %v858_v35  ;;  %v2837_v52 = vsel %vm839_vm12, %v840_v49, %v838_v13  ;;  %v2840_v47 = vmul.f32 %v2679_v31, %v774_v63 }
  0xb9   :  { %1737 = vmatmul.msk.f32.gmra.mxu0 %vm79_vm0, %v2247_v7  ;;  %1753 = vmatmul.msk.f32.gmra.mxu2 %vm79_vm0, %v2446_v11  ;;  %v869_v22 = vmul.f32 0.5, %v868_v17  ;;  %v1037_v29 = vor.u32 1.1754944e-38, %v1036_v20  ;;  %1889 = vrcp.f32 %v2837_v52  ;;  %v2852_v49 = vmul.f32 %v2751_v33, %v810_v38 }
  0xba   :  { %v846_v45 = vsub.f32 1.5, %v845_v34  ;;  %1785 = vmatmul.msk.f32.gmra.mxu1 %vm79_vm0, %v2247_v7  ;;  %1801 = vmatmul.msk.f32.gmra.mxu3 %vm79_vm0, %v2446_v11  ;;  %vm1255_vm1 = vweird.f32 %v829_v56  ;;  %v658_v7 = vsel %vm657_vm14, %v2486_v5, %v2634_v2  ;;  %v2860_v31 = vmul.f32 %v859_v26, %v2717_v36 }
  0xbb   :  { %v1886_v54 = vpop.eup %1885  ;;  %vm2862_vm0 = vcmp.eq.f32.partialorder %v1259_v51, 8.507059e+37  ;;  %v1262_v23 = vor.u32 1.1754944e-38, %v1261_v44  ;;  %v870_v8 = vsub.f32 1.5, %v869_v22  ;;  %v1029_v12 = vadd.f32 %v2784_v9, %v1028_v42 }
  0xbc   :  { %v1888_v11 = vpop.eup %1887  ;;  %v879_v33 = vmul.f32 %v1886_v54, %v2811_v46  ;;  %v847_v20 = vmul.f32 %v1880_v61, %v846_v45  ;;  %vm1270_vm4 = vweird.f32 %v2837_v52  ;;  %v1274_v38 = vand.u32 2147483647, %v2837_v52 }
  0xbd   :  { %v1251_v59 = vmul.f32 %v1888_v11, %v829_v56  ;;  %v891_v26 = vmul.f32 %v2830_v58, %v2791_v14  ;;  %vm1256_vm5 = vweird.f32 %v1888_v11  ;;  %v1276_v22 = vand.u32 2147483648, %v2837_v52 }
  0xbe   :  { %v289_v35 = vpop.f32.mrf.mxu0  ;;  %v880_v17 = vmul.f32 %v1886_v54, %v879_v33  ;;  %v660_v42 = vand.u32 2147483648, %v2486_v5  ;;  %vm2890_vm7 = vmor %vm1255_vm1, %vm1256_vm5  ;;  %vm2902_vm9 = vcmp.eq.f32.partialorder %v1274_v38, 8.507059e+37  ;;  %vm849_vm10 = vcmp.eq.f32.partialorder %v2757_v55, inf }
  0xbf   :  { %v1490_v61 = vmul.f32 %v2775_v32, %v289_v35  ;;  %v402_v51 = vpop.f32.mrf.mxu1  ;;  %v1252_v44 = vsub.f32 1.0, %v1251_v59  ;;  %v1890_v13 = vpop.eup %1889  ;;  %v1033_v35 = vsel %vm2870_vm3, %v2784_v9, %v1029_v12  ;;  %v848_v9 = vmul.f32 %v847_v20, %v2757_v55 }
  0xc0   :  { %v1491_v27 = vmul.f32 %v2775_v32, %v402_v51  ;;  %v881_v45 = vmul.f32 0.5, %v880_v17  ;;  %v1266_v59 = vmul.f32 %v1890_v13, %v2837_v52  ;;  %v892_v17 = vmul.f32 %v2830_v58, %v891_v26  ;;  %v2922_v52 = vpop.xlane.xlu2 %600 }
  0xc1   :  { %v1560_v33 = vmul.f32 %v2748_v21, %v1490_v61  ;;  %v1253_v25 = vmul.f32 %v1888_v11, %v1252_v44  ;;  %v2895_v5 = vsel %vm659_vm6, %v660_v42, %v658_v7  ;;  %vm1271_vm8 = vweird.f32 %v1890_v13 }
  0xc2   :  { %v1561_v1 = vmul.f32 %v2771_v24, %v1491_v27  ;;  %v882_v32 = vsub.f32 1.5, %v881_v45  ;;  %v1267_v51 = vsub.f32 1.0, %v1266_v59  ;;  %1891 = vrcp.f32 %v2895_v5  ;;  %vm2914_vm11 = vmor %vm1270_vm4, %vm1271_vm8 }
  0xc3   :  { %1624 = vst [vmem:[#allocation2] sm:$0xff] %v1560_v33  ;;  %v1254_v61 = vadd.f32 %v1888_v11, %v1253_v25  ;;  %v871_v12 = vmul.f32 %v2808_v4, %v870_v8  ;;  %v1038_v2 = vsel %vm2846_vm15, %v1037_v29, %v1033_v35  ;;  %v1277_v27 = vor.u32 1.1754944e-38, %v1276_v22 }
  0xc4   :  { %1625 = vst [vmem:[#allocation2 + $0x8] sm:$0xff] %v1561_v1  ;;  %v337_v56 = vpop.f32.mrf.mxu2  ;;  %v1268_v26 = vmul.f32 %v1890_v13, %v1267_v51  ;;  %v883_v1 = vmul.f32 %v1886_v54, %v882_v32  ;;  %v893_v29 = vmul.f32 0.5, %v892_v17  ;;  %vm1045_vm12 = vweird.f32 %v2895_v5 }
  0xc5   :  { %v1258_v25 = vsel %vm2890_vm7, %v1888_v11, %v1254_v61  ;;  %v450_v7 = vpop.f32.mrf.mxu3  ;;  %v850_v63 = vsel %vm849_vm10, %v2757_v55, %v848_v9  ;;  %v852_v54 = vand.u32 2147483648, %v2757_v55  ;;  %v1051_v55 = vand.u32 2147483648, %v2895_v5 }
  0xc6   :  { %v1263_v4 = vsel %vm2862_vm0, %v1262_v23, %v1258_v25  ;;  %v292_v20 = vpop.f32.mrf.mxu0  ;;  %v1269_v45 = vadd.f32 %v1890_v13, %v1268_v26  ;;  %v1049_v51 = vand.u32 2147483647, %v2895_v5  ;;  %1893 = vrsqrt.f32 %v2922_v52 }
  0xc7   :  { %v1522_v43 = vmul.f32 %v1263_v4, %v337_v56  ;;  %v1523_v11 = vmul.f32 %v1263_v4, %v450_v7  ;;  %v1492_v8 = vmul.f32 %v1038_v2, %v292_v20  ;;  %v405_v38 = vpop.f32.mrf.mxu1  ;;  %v2935_v9 = vsel %vm851_vm13, %v852_v54, %v850_v63 }
  0xc8   :  { %v1493_v22 = vmul.f32 %v1038_v2, %v405_v38  ;;  %v1892_v23 = vpop.eup %1891  ;;  %v1273_v59 = vsel %vm2914_vm11, %v1890_v13, %v1269_v45  ;;  %vm669_vm14 = vcmp.eq.f32.partialorder %v2503_v18, inf  ;;  %1895 = vrcp.f32 %v2935_v9 }
  0xc9   :  { %v1592_v42 = vmul.f32 %v2748_v21, %v1522_v43  ;;  %v1593_v33 = vmul.f32 %v2771_v24, %v1523_v11  ;;  %v1562_v35 = vmul.f32 %v2748_v21, %v1492_v8  ;;  %v1278_v17 = vsel %vm2902_vm9, %v1277_v27, %v1273_v59 }
  0xca   :  { %v1563_v32 = vmul.f32 %v2771_v24, %v1493_v22  ;;  %v1041_v61 = vmul.f32 %v1892_v23, %v2895_v5  ;;  %vm1046_vm15 = vweird.f32 %v1892_v23  ;;  %vm671_vm1 = vcmp.eq.f32.partialorder %v2503_v18, 0.0 }
  0xcb   :  { %1656 = vst [vmem:[#allocation2 + $0x100] sm:$0xff] %v1592_v42  ;;  %v894_v25 = vsub.f32 1.5, %v893_v29  ;;  %v670_v7 = vsel %vm669_vm14, %v2503_v18, %v2644_v57  ;;  %v672_v26 = vand.u32 2147483648, %v2503_v18  ;;  %v2945_v27 = vmul.f32 %v871_v12, %v2759_v60  ;;  %vm2951_vm2 = vmor %vm1045_vm12, %vm1046_vm15  ;;  %v2959_v18 = vpop.xlane.xlu0 %603 }
  0xcc   :  { %1657 = vst [vmem:[#allocation2 + $0x108] sm:$0xff] %v1593_v33  ;;  %v340_v13 = vpop.f32.mrf.mxu2  ;;  %v1042_v56 = vsub.f32 1.0, %v1041_v61  ;;  %v1052_v34 = vor.u32 1.1754944e-38, %v1051_v55  ;;  %v1289_v57 = vand.u32 2147483647, %v2935_v9  ;;  %vm861_vm0 = vcmp.eq.f32.partialorder %v2717_v36, inf  ;;  %v2967_v5 = vpop.eup %1893 }
  0xcd   :  { %1626 = vst [vmem:[#allocation2 + $0x10] sm:$0xff] %v1562_v35  ;;  %v1524_v2 = vmul.f32 %v1278_v17, %v340_v13  ;;  %v453_v44 = vpop.f32.mrf.mxu3  ;;  %v2956_v29 = vsel %vm671_vm1, %v672_v26, %v670_v7  ;;  %vm2962_vm3 = vcmp.eq.f32.partialorder %v1049_v51, 8.507059e+37  ;;  %v2970_v45 = vmul.f32 %v883_v1, %v2811_v46 }
  0xce   :  { %1627 = vst [vmem:[#allocation2 + $0x18] sm:$0xff] %v1563_v32  ;;  %v1525_v4 = vmul.f32 %v1278_v17, %v453_v44  ;;  %v1043_v20 = vmul.f32 %v1892_v23, %v1042_v56  ;;  %1897 = vrcp.f32 %v2956_v29  ;;  %v2973_v22 = vmul.f32 %v2830_v58, %v894_v25  ;;  %v295_v63 = vpop.f32.mrf.mxu0  ;;  %v1896_v33 = vpop.eup %1895 }
  0xcf   :  { %v1594_v43 = vmul.f32 %v2748_v21, %v1524_v2  ;;  %v408_v54 = vpop.f32.mrf.mxu1  ;;  %vm1285_vm4 = vweird.f32 %v2935_v9  ;;  %v864_v42 = vand.u32 2147483648, %v2717_v36  ;;  %v862_v1 = vsel %vm861_vm0, %v2717_v36, %v2860_v31 }
  0xd0   :  { %v1595_v12 = vmul.f32 %v2771_v24, %v1525_v4  ;;  %v1044_v8 = vadd.f32 %v1892_v23, %v1043_v20  ;;  %vm863_vm5 = vcmp.eq.f32.partialorder %v2717_v36, 0.0  ;;  %1899 = vrsqrt.f32 %v2959_v18 }
  0xd1   :  { %1658 = vst [vmem:[#allocation2 + $0x110] sm:$0xff] %v1594_v43  ;;  %v1281_v59 = vmul.f32 %v1896_v33, %v2935_v9  ;;  %vm2988_vm6 = vcmp.eq.f32.partialorder %v1289_v57, 8.507059e+37  ;;  %v903_v31 = vmul.f32 %v2967_v5, %v2922_v52  ;;  %vm681_vm7 = vcmp.eq.f32.partialorder %v2496_v15, inf }
  0xd2   :  { %1659 = vst [vmem:[#allocation2 + $0x118] sm:$0xff] %v1595_v12  ;;  %v1048_v35 = vsel %vm2951_vm2, %v1892_v23, %v1044_v8  ;;  %v1291_v23 = vand.u32 2147483648, %v2935_v9  ;;  %vm1286_vm8 = vweird.f32 %v1896_v33  ;;  %v1064_v55 = vand.u32 2147483647, %v2956_v29 }
  0xd3   :  { %v1053_v58 = vsel %vm2962_vm3, %v1052_v34, %v1048_v35  ;;  %v1282_v36 = vsub.f32 1.0, %v1281_v59  ;;  %v2997_v51 = vsel %vm863_vm5, %v864_v42, %v862_v1  ;;  %v1066_v44 = vand.u32 2147483648, %v2956_v29  ;;  %vm3011_vm10 = vmor %vm1285_vm4, %vm1286_vm8 }
  0xd4   :  { %v1494_v17 = vmul.f32 %v1053_v58, %v295_v63  ;;  %v1495_v61 = vmul.f32 %v1053_v58, %v408_v54  ;;  %v1898_v13 = vpop.eup %1897  ;;  %1901 = vrcp.f32 %v2997_v51  ;;  %v682_v26 = vsel %vm681_vm7, %v2496_v15, %v2641_v6  ;;  %v343_v9 = vpop.f32.mrf.mxu2 }
  0xd5   :  { %v1283_v25 = vmul.f32 %v1896_v33, %v1282_v36  ;;  %v1056_v7 = vmul.f32 %v1898_v13, %v2956_v29  ;;  %vm683_vm9 = vcmp.eq.f32.partialorder %v2496_v15, 0.0  ;;  %v1292_v34 = vor.u32 1.1754944e-38, %v1291_v23  ;;  %v456_v8 = vpop.f32.mrf.mxu3 }
  0xd6   :  { %v1564_v56 = vmul.f32 %v2748_v21, %v1494_v17  ;;  %v1565_v2 = vmul.f32 %v2771_v24, %v1495_v61  ;;  %v3007_v4 = vpop.eup %1899  ;;  %v904_v43 = vmul.f32 %v2967_v5, %v903_v31  ;;  %vm1060_vm11 = vweird.f32 %v2956_v29  ;;  %v298_v32 = vpop.f32.mrf.mxu0 }
  0xd7   :  { %v684_v11 = vand.u32 2147483648, %v2496_v15  ;;  %v1284_v6 = vadd.f32 %v1896_v33, %v1283_v25  ;;  %v1057_v57 = vsub.f32 1.0, %v1056_v7  ;;  %vm1061_vm12 = vweird.f32 %v1898_v13 }
  0xd8   :  { %1628 = vst [vmem:[#allocation2 + $0x20] sm:$0xff] %v1564_v56  ;;  %vm3018_vm13 = vcmp.eq.f32.partialorder %v1064_v55, 8.507059e+37  ;;  %v1304_v38 = vand.u32 2147483647, %v2997_v51  ;;  %v1306_v63 = vand.u32 2147483648, %v2997_v51  ;;  %v915_v54 = vmul.f32 %v3007_v4, %v2959_v18  ;;  %vm3040_vm14 = vmor %vm1060_vm11, %vm1061_vm12  ;;  %v411_v55 = vpop.f32.mrf.mxu1 }
  0xd9   :  { %1629 = vst [vmem:[#allocation2 + $0x28] sm:$0xff] %v1565_v2  ;;  %v3028_v42 = vsel %vm683_vm9, %v684_v11, %v682_v26  ;;  %v1288_v35 = vsel %vm3011_vm10, %v1896_v33, %v1284_v6  ;;  %v1058_v1 = vmul.f32 %v1898_v13, %v1057_v57  ;;  %v1067_v58 = vor.u32 1.1754944e-38, %v1066_v44  ;;  %v3064_v11 = vpop.xlane.xlu1 %606 }
  0xda   :  { %1903 = vrcp.f32 %v3028_v42  ;;  %v1902_v59 = vpop.eup %1901  ;;  %v1293_v23 = vsel %vm2988_vm6, %v1292_v34, %v1288_v35  ;;  %v3035_v17 = vmul.f32 0.5, %v904_v43  ;;  %vm1300_vm15 = vweird.f32 %v2997_v51 }
  0xdb   :  { %vm873_vm1 = vcmp.eq.f32.partialorder %v2759_v60, inf  ;;  %v1526_v33 = vmul.f32 %v1293_v23, %v343_v9  ;;  %v1527_v61 = vmul.f32 %v1293_v23, %v456_v8  ;;  %v1059_v31 = vadd.f32 %v1898_v13, %v1058_v1 }
  0xdc   :  { %v1296_v36 = vmul.f32 %v1902_v59, %v2997_v51  ;;  %vm1301_vm2 = vweird.f32 %v1902_v59  ;;  %vm3047_vm0 = vcmp.eq.f32.partialorder %v1304_v38, 8.507059e+37  ;;  %v1307_v29 = vor.u32 1.1754944e-38, %v1306_v63  ;;  %v346_v51 = vpop.f32.mrf.mxu2 }
  0xdd   :  { %v916_v2 = vmul.f32 %v3007_v4, %v915_v54  ;;  %v1596_v44 = vmul.f32 %v2748_v21, %v1526_v33  ;;  %v1597_v25 = vmul.f32 %v2771_v24, %v1527_v61  ;;  %v1063_v7 = vsel %vm3040_vm14, %v1898_v13, %v1059_v31  ;;  %vm3070_vm5 = vmor %vm1300_vm15, %vm1301_vm2 }
  0xde   :  { %v1297_v26 = vsub.f32 1.0, %v1296_v36  ;;  %v1068_v20 = vsel %vm3018_vm13, %v1067_v58, %v1063_v7  ;;  %vm1075_vm3 = vweird.f32 %v3028_v42  ;;  %v1079_v34 = vand.u32 2147483647, %v3028_v42  ;;  %v459_v58 = vpop.f32.mrf.mxu3 }
  0xdf   :  { %v874_v43 = vsel %vm873_vm1, %v2759_v60, %v2945_v27  ;;  %1660 = vst [vmem:[#allocation2 + $0x120] sm:$0xff] %v1596_v44  ;;  %v1496_v57 = vmul.f32 %v1068_v20, %v298_v32  ;;  %v1497_v9 = vmul.f32 %v1068_v20, %v411_v55  ;;  %vm875_vm4 = vcmp.eq.f32.partialorder %v2759_v60, 0.0 }
  0xe0   :  { %v1904_v6 = vpop.eup %1903  ;;  %v1298_v13 = vmul.f32 %v1902_v59, %v1297_v26  ;;  %1661 = vst [vmem:[#allocation2 + $0x128] sm:$0xff] %v1597_v25  ;;  %v3074_v8 = vmul.f32 0.5, %v916_v2  ;;  %v1081_v38 = vand.u32 2147483648, %v3028_v42  ;;  %v876_v63 = vand.u32 2147483648, %v2759_v60  ;;  %v301_v26 = vpop.f32.mrf.mxu0 }
  0xe1   :  { %v1071_v27 = vmul.f32 %v1904_v6, %v3028_v42  ;;  %v1566_v54 = vmul.f32 %v2748_v21, %v1496_v57  ;;  %v1567_v35 = vmul.f32 %v2771_v24, %v1497_v9  ;;  %1905 = vrsqrt.f32 %v3064_v11  ;;  %v414_v20 = vpop.f32.mrf.mxu1 }
  0xe2   :  { %v1299_v1 = vadd.f32 %v1902_v59, %v1298_v13  ;;  %vm1076_vm6 = vweird.f32 %v1904_v6  ;;  %v3082_v15 = vsel %vm875_vm4, %v876_v63, %v874_v43  ;;  %vm693_vm7 = vcmp.eq.f32.partialorder %v2514_v19, inf }
  0xe3   :  { %v1072_v23 = vsub.f32 1.0, %v1071_v27  ;;  %v906_v33 = vsub.f32 1.5, %v3035_v17  ;;  %1630 = vst [vmem:[#allocation2 + $0x30] sm:$0xff] %v1566_v54  ;;  %vm3088_vm8 = vcmp.eq.f32.partialorder %v1079_v34, 8.507059e+37  ;;  %1907 = vrcp.f32 %v3082_v15  ;;  %vm3099_vm9 = vmor %vm1075_vm3, %vm1076_vm6 }
  0xe4   :  { %v1303_v60 = vsel %vm3070_vm5, %v1902_v59, %v1299_v1  ;;  %1631 = vst [vmem:[#allocation2 + $0x38] sm:$0xff] %v1567_v35  ;;  %v918_v36 = vsub.f32 1.5, %v3074_v8  ;;  %v1082_v55 = vor.u32 1.1754944e-38, %v1081_v38  ;;  %v694_v44 = vsel %vm693_vm7, %v2514_v19, %v2647_v16  ;;  %v3136_v1 = vpop.xlane.xlu2 %609 }
  0xe5   :  { %v1308_v31 = vsel %vm3047_vm0, %v1307_v29, %v1303_v60  ;;  %v1073_v32 = vmul.f32 %v1904_v6, %v1072_v23  ;;  %vm695_vm10 = vcmp.eq.f32.partialorder %v2514_v19, 0.0  ;;  %vm1315_vm11 = vweird.f32 %v3082_v15  ;;  %v3141_v60 = vpop.xlane.xlu1 %615 }
  0xe6   :  { %v1528_v2 = vmul.f32 %v1308_v31, %v346_v51  ;;  %v1529_v17 = vmul.f32 %v1308_v31, %v459_v58  ;;  %v696_v29 = vand.u32 2147483648, %v2514_v19  ;;  %vm885_vm12 = vcmp.eq.f32.partialorder %v2811_v46, inf }
  0xe7   :  { %v1074_v56 = vadd.f32 %v1904_v6, %v1073_v32  ;;  %v3109_v25 = vpop.eup %1905  ;;  %v886_v16 = vsel %vm885_vm12, %v2811_v46, %v2970_v45  ;;  %vm887_vm13 = vcmp.eq.f32.partialorder %v2811_v46, 0.0  ;;  %v888_v57 = vand.u32 2147483648, %v2811_v46 }
  0xe8   :  { %v1598_v42 = vmul.f32 %v2748_v21, %v1528_v2  ;;  %v1599_v7 = vmul.f32 %v2771_v24, %v1529_v17  ;;  %v927_v19 = vmul.f32 %v3109_v25, %v3064_v11  ;;  %v3120_v43 = vsel %vm695_vm10, %v696_v29, %v694_v44  ;;  %v3158_v17 = vpop.xlane.xlu0 %612  ;;  %v462_v44 = vpop.f32.mrf.mxu3 }
  0xe9   :  { %v1078_v34 = vsel %vm3099_vm9, %v1904_v6, %v1074_v56  ;;  %v1908_v9 = vpop.eup %1907  ;;  %v1319_v12 = vand.u32 2147483647, %v3082_v15  ;;  %v1321_v45 = vand.u32 2147483648, %v3082_v15  ;;  %1909 = vrcp.f32 %v3120_v43  ;;  %v417_v32 = vpop.f32.mrf.mxu1 }
  0xea   :  { %1662 = vst [vmem:[#allocation2 + $0x130] sm:$0xff] %v1598_v42  ;;  %v1083_v13 = vsel %vm3088_vm8, %v1082_v55, %v1078_v34  ;;  %v1311_v27 = vmul.f32 %v1908_v9, %v3082_v15  ;;  %v1094_v38 = vand.u32 2147483647, %v3120_v43  ;;  %vm1316_vm14 = vweird.f32 %v1908_v9 }
  0xeb   :  { %1663 = vst [vmem:[#allocation2 + $0x138] sm:$0xff] %v1599_v7  ;;  %v1498_v6 = vmul.f32 %v1083_v13, %v301_v26  ;;  %v1499_v8 = vmul.f32 %v1083_v13, %v414_v20  ;;  %v928_v63 = vmul.f32 %v3109_v25, %v927_v19  ;;  %v1096_v54 = vand.u32 2147483648, %v3120_v43  ;;  %vm3164_vm2 = vmor %vm1315_vm11, %vm1316_vm14 }
  0xec   :  { %v3134_v35 = vsel %vm887_vm13, %v888_v57, %v886_v16  ;;  %v1312_v23 = vsub.f32 1.0, %v1311_v27  ;;  %v3145_v61 = vmul.f32 %v2973_v22, %v2791_v14  ;;  %v3148_v31 = vmul.f32 %v2967_v5, %v906_v33 }
  0xed   :  { %v1568_v51 = vmul.f32 %v2748_v21, %v1498_v6  ;;  %v1569_v58 = vmul.f32 %v2771_v24, %v1499_v8  ;;  %1911 = vrcp.f32 %v3134_v35  ;;  %v3151_v46 = vmul.f32 %v3007_v4, %v918_v36  ;;  %v349_v36 = vpop.f32.mrf.mxu2 }
  0xee   :  { %vm3153_vm15 = vcmp.eq.f32.partialorder %v1319_v12, 8.507059e+37  ;;  %v1313_v55 = vmul.f32 %v1908_v9, %v1312_v23  ;;  %v1322_v2 = vor.u32 1.1754944e-38, %v1321_v45  ;;  %1913 = vrsqrt.f32 %v3136_v1 }
  0xef   :  { %1632 = vst [vmem:[#allocation2 + $0x40] sm:$0xff] %v1568_v51  ;;  %vm705_vm1 = vcmp.eq.f32.partialorder %v2553_v40, inf  ;;  %v1910_v22 = vpop.eup %1909  ;;  %v3168_v4 = vmul.f32 0.5, %v928_v63  ;;  %vm1090_vm0 = vweird.f32 %v3120_v43  ;;  %vm3171_vm3 = vcmp.eq.f32.partialorder %v1094_v38, 8.507059e+37 }
  0xf0   :  { %1633 = vst [vmem:[#allocation2 + $0x48] sm:$0xff] %v1569_v58  ;;  %1915 = vrsqrt.f32 %v3141_v60  ;;  %v1314_v59 = vadd.f32 %v1908_v9, %v1313_v55  ;;  %v1086_v56 = vmul.f32 %v1910_v22, %v3120_v43  ;;  %v1097_v15 = vor.u32 1.1754944e-38, %v1096_v54  ;;  %v304_v43 = vpop.f32.mrf.mxu0 }
  0xf1   :  { %vm1330_vm4 = vweird.f32 %v3134_v35  ;;  %1917 = vrsqrt.f32 %v3158_v17  ;;  %v706_v29 = vsel %vm705_vm1, %v2553_v40, %v2706_v41  ;;  %vm707_vm5 = vcmp.eq.f32.partialorder %v2553_v40, 0.0 }
  0xf2   :  { %v708_v42 = vand.u32 2147483648, %v2553_v40  ;;  %v1318_v26 = vsel %vm3164_vm2, %v1908_v9, %v1314_v59  ;;  %v1087_v20 = vsub.f32 1.0, %v1086_v56  ;;  %vm1091_vm6 = vweird.f32 %v1910_v22 }
  0xf3   :  { %v1912_v7 = vpop.eup %1911  ;;  %v1334_v16 = vand.u32 2147483647, %v3134_v35  ;;  %v1323_v34 = vsel %vm3153_vm15, %v1322_v2, %v1318_v26  ;;  %v930_v19 = vsub.f32 1.5, %v3168_v4  ;;  %v1336_v41 = vand.u32 2147483648, %v3134_v35  ;;  %vm3195_vm7 = vmor %vm1090_vm0, %vm1091_vm6 }
  0xf4   :  { %v1326_v57 = vmul.f32 %v1912_v7, %v3134_v35  ;;  %v1914_v13 = vpop.eup %1913  ;;  %v1530_v12 = vmul.f32 %v1323_v34, %v349_v36  ;;  %v1531_v40 = vmul.f32 %v1323_v34, %v462_v44  ;;  %v1088_v45 = vmul.f32 %v1910_v22, %v1087_v20 }
  0xf5   :  { %v3191_v6 = vsel %vm707_vm5, %v708_v42, %v706_v29  ;;  %vm1331_vm8 = vweird.f32 %v1912_v7  ;;  %v939_v38 = vmul.f32 %v1914_v13, %v3136_v1  ;;  %vm3206_vm9 = vcmp.eq.f32.partialorder %v1334_v16, 8.507059e+37  ;;  %v352_v20 = vpop.f32.mrf.mxu2  ;;  %v465_v16 = vpop.f32.mrf.mxu3 }
  0xf6   :  { %v1916_v9 = vpop.eup %1915  ;;  %v1327_v27 = vsub.f32 1.0, %v1326_v57  ;;  %1919 = vrcp.f32 %v3191_v6  ;;  %v1600_v63 = vmul.f32 %v2748_v21, %v1530_v12  ;;  %v1601_v54 = vmul.f32 %v2771_v24, %v1531_v40  ;;  %vm3215_vm10 = vmor %vm1330_vm4, %vm1331_vm8 }
  0xf7   :  { %v1089_v51 = vadd.f32 %v1910_v22, %v1088_v45  ;;  %v963_v58 = vmul.f32 %v1916_v9, %v3141_v60  ;;  %v3204_v23 = vpop.eup %1917  ;;  %v1337_v5 = vor.u32 1.1754944e-38, %v1336_v41  ;;  %v940_v4 = vmul.f32 %v1914_v13, %v939_v38 }
  0xf8   :  { %v1328_v55 = vmul.f32 %v1912_v7, %v1327_v27  ;;  %1664 = vst [vmem:[#allocation2 + $0x140] sm:$0xff] %v1600_v63  ;;  %v951_v56 = vmul.f32 %v3204_v23, %v3158_v17  ;;  %vm897_vm11 = vcmp.eq.f32.partialorder %v2791_v14, inf  ;;  %vm899_vm12 = vcmp.eq.f32.partialorder %v2791_v14, 0.0 }
  0xf9   :  { %v1093_v36 = vsel %vm3195_vm7, %v1910_v22, %v1089_v51  ;;  %v964_v44 = vmul.f32 %v1916_v9, %v963_v58  ;;  %1665 = vst [vmem:[#allocation2 + $0x148] sm:$0xff] %v1601_v54  ;;  %v941_v26 = vmul.f32 0.5, %v940_v4  ;;  %v898_v33 = vsel %vm897_vm11, %v2791_v14, %v3145_v61 }
  0xfa   :  { %v1098_v29 = vsel %vm3171_vm3, %v1097_v15, %v1093_v36  ;;  %v1329_v42 = vadd.f32 %v1912_v7, %v1328_v55  ;;  %v952_v57 = vmul.f32 %v3204_v23, %v951_v56  ;;  %v900_v15 = vand.u32 2147483648, %v2791_v14  ;;  %v3253_v36 = vpop.xlane.xlu1 %624 }
  0xfb   :  { %v1500_v22 = vmul.f32 %v1098_v29, %v304_v43  ;;  %v1501_v35 = vmul.f32 %v1098_v29, %v417_v32  ;;  %v965_v34 = vmul.f32 0.5, %v964_v44  ;;  %v942_v40 = vsub.f32 1.5, %v941_v26  ;;  %v3246_v32 = vpop.xlane.xlu2 %618 }
  0xfc   :  { %v3226_v41 = vpop.eup %1919  ;;  %v1333_v12 = vsel %vm3215_vm10, %v1912_v7, %v1329_v42  ;;  %v931_v63 = vmul.f32 %v3109_v25, %v930_v19  ;;  %v953_v58 = vmul.f32 0.5, %v952_v57  ;;  %vm1105_vm13 = vweird.f32 %v3191_v6 }
  0xfd   :  { %v1570_v45 = vmul.f32 %v2748_v21, %v1500_v22  ;;  %v1571_v8 = vmul.f32 %v2771_v24, %v1501_v35  ;;  %v1338_v27 = vsel %vm3206_vm9, %v1337_v5, %v1333_v12  ;;  %v966_v38 = vsub.f32 1.5, %v965_v34  ;;  %v307_v35 = vpop.f32.mrf.mxu0 }
  0xfe   :  { %v1532_v54 = vmul.f32 %v1338_v27, %v352_v20  ;;  %v1533_v51 = vmul.f32 %v1338_v27, %v465_v16  ;;  %v1101_v7 = vmul.f32 %v3226_v41, %v3191_v6  ;;  %v1109_v61 = vand.u32 2147483647, %v3191_v6  ;;  %v420_v20 = vpop.f32.mrf.mxu1 }
  0xff   :  { %1634 = vst [vmem:[#allocation2 + $0x50] sm:$0xff] %v1570_v45  ;;  %v3244_v43 = vsel %vm899_vm12, %v900_v15, %v898_v33  ;;  %v943_v55 = vmul.f32 %v1914_v13, %v942_v40  ;;  %v1111_v2 = vand.u32 2147483648, %v3191_v6  ;;  %v967_v5 = vmul.f32 %v1916_v9, %v966_v38 }
 0x100   :  { %1635 = vst [vmem:[#allocation2 + $0x58] sm:$0xff] %v1571_v8  ;;  %v1602_v25 = vmul.f32 %v2748_v21, %v1532_v54  ;;  %v1603_v19 = vmul.f32 %v2771_v24, %v1533_v51  ;;  %v1102_v4 = vsub.f32 1.0, %v1101_v7  ;;  %vm1106_vm14 = vweird.f32 %v3226_v41 }
 0x101   :  { %1921 = vrcp.f32 %v3244_v43  ;;  %v3257_v14 = vmul.f32 %v2787_v10, %v2626_v50  ;;  %v3261_v59 = vmul.f32 %v2840_v47, %v2628_v28  ;;  %v954_v13 = vsub.f32 1.5, %v953_v58  ;;  %v3275_v47 = vpop.xlane.xlu0 %621  ;;  %vm3284_vm15 = vmor %vm1105_vm13, %vm1106_vm14 }
 0x102   :  { %1666 = vst [vmem:[#allocation2 + $0x150] sm:$0xff] %v1602_v25  ;;  %1923 = vrsqrt.f32 %v3246_v32  ;;  %v3266_v9 = vmul.f32 %v2852_v49, %v2685_v37  ;;  %v908_v44 = vmul.f32 %v3148_v31, %v2922_v52  ;;  %v3272_v56 = vmul.f32 %v3151_v46, %v2959_v18 }
 0x103   :  { %1667 = vst [vmem:[#allocation2 + $0x158] sm:$0xff] %v1603_v19  ;;  %v1103_v10 = vmul.f32 %v3226_v41, %v1102_v4  ;;  %v3278_v29 = vmul.f32 %v931_v63, %v3064_v11  ;;  %vm3288_vm1 = vcmp.eq.f32.partialorder %v1109_v61, 8.507059e+37  ;;  %v1112_v46 = vor.u32 1.1754944e-38, %v1111_v2 }
 0x104   :  { %1925 = vrsqrt.f32 %v3253_v36  ;;  %v3294_v42 = vmul.f32 %v943_v55, %v3136_v1  ;;  %v3297_v26 = vmul.f32 %v967_v5, %v3141_v60  ;;  %vm1345_vm2 = vweird.f32 %v3244_v43 }
 0x105   :  { %v1104_v22 = vadd.f32 %v3226_v41, %v1103_v10  ;;  %v955_v6 = vmul.f32 %v3204_v23, %v954_v13  ;;  %v1349_v16 = vand.u32 2147483647, %v3244_v43  ;;  %v1351_v34 = vand.u32 2147483648, %v3244_v43 }
 0x106   :  { %1927 = vrsqrt.f32 %v3275_v47  ;;  %vm717_vm0 = vcmp.eq.f32.partialorder %v2529_v30, inf  ;;  %vm719_vm3 = vcmp.eq.f32.partialorder %v2529_v30, 0.0  ;;  %v720_v40 = vand.u32 2147483648, %v2529_v30 }
 0x107   :  { %v1922_v57 = vpop.eup %1921  ;;  %v1108_v12 = vsel %vm3284_vm15, %v3226_v41, %v1104_v22  ;;  %v984_v45 = vand.u32 2147483648, %v3246_v32  ;;  %v718_v8 = vsel %vm717_vm0, %v2529_v30, %v2654_v0  ;;  %v3321_v51 = vmul.f32 %v955_v6, %v3158_v17  ;;  %v355_v22 = vpop.f32.mrf.mxu2 }
 0x108   :  { %v1924_v23 = vpop.eup %1923  ;;  %v1113_v33 = vsel %vm3288_vm1, %v1112_v46, %v1108_v12  ;;  %v1341_v15 = vmul.f32 %v1922_v57, %v3244_v43  ;;  %v3318_v63 = vsel %vm719_vm3, %v720_v40, %v718_v8  ;;  %vm1346_vm4 = vweird.f32 %v1922_v57  ;;  %v468_v6 = vpop.f32.mrf.mxu3 }
 0x109   :  { %v1502_v27 = vmul.f32 %v1113_v33, %v307_v35  ;;  %v1503_v38 = vmul.f32 %v1113_v33, %v420_v20  ;;  %v975_v41 = vmul.f32 %v1924_v23, %v3246_v32  ;;  %1929 = vrcp.f32 %v3318_v63  ;;  %vm3335_vm8 = vmor %vm1345_vm2, %vm1346_vm4 }
 0x10a   :  { %v1926_v54 = vpop.eup %1925  ;;  %v1342_v58 = vsub.f32 1.0, %v1341_v15  ;;  %vm3327_vm5 = vcmp.eq.f32.partialorder %v1349_v16, 8.507059e+37  ;;  %v1352_v2 = vor.u32 1.1754944e-38, %v1351_v34  ;;  %vm981_vm6 = vcmp.eq.f32.partialorder %v3246_v32, inf }
 0x10b   :  { %v1572_v7 = vmul.f32 %v2748_v21, %v1502_v27  ;;  %v1573_v61 = vmul.f32 %v2771_v24, %v1503_v38  ;;  %v976_v25 = vmul.f32 %v1924_v23, %v975_v41  ;;  %v999_v30 = vmul.f32 %v1926_v54, %v3253_v36 }
 0x10c   :  { %v1928_v0 = vpop.eup %1927  ;;  %v1343_v19 = vmul.f32 %v1922_v57, %v1342_v58  ;;  %vm909_vm7 = vcmp.eq.f32.partialorder %v2922_v52, inf  ;;  %vm1005_vm9 = vcmp.eq.f32.partialorder %v3253_v36, inf  ;;  %v1008_v46 = vand.u32 2147483648, %v3253_v36 }
 0x10d   :  { %1636 = vst [vmem:[#allocation2 + $0x60] sm:$0xff] %v1572_v7  ;;  %v977_v4 = vmul.f32 0.5, %v976_v25  ;;  %v1000_v13 = vmul.f32 %v1926_v54, %v999_v30  ;;  %v987_v10 = vmul.f32 %v1928_v0, %v3275_v47  ;;  %v910_v49 = vsel %vm909_vm7, %v2922_v52, %v908_v44 }
 0x10e   :  { %1637 = vst [vmem:[#allocation2 + $0x68] sm:$0xff] %v1573_v61  ;;  %v1344_v31 = vadd.f32 %v1922_v57, %v1343_v19  ;;  %vm911_vm10 = vcmp.eq.f32.partialorder %v2922_v52, 0.0  ;;  %v912_v43 = vand.u32 2147483648, %v2922_v52  ;;  %vm1120_vm11 = vweird.f32 %v3318_v63 }
 0x10f   :  { %v978_v35 = vsub.f32 1.5, %v977_v4  ;;  %v1001_v20 = vmul.f32 0.5, %v1000_v13  ;;  %v988_v16 = vmul.f32 %v1928_v0, %v987_v10  ;;  %v1930_v34 = vpop.eup %1929  ;;  %v1124_v12 = vand.u32 2147483647, %v3318_v63 }
 0x110   :  { %v1348_v44 = vsel %vm3335_vm8, %v1922_v57, %v1344_v31  ;;  %v1126_v40 = vand.u32 2147483648, %v3318_v63  ;;  %v3350_v33 = vsel %vm911_vm10, %v912_v43, %v910_v49  ;;  %v1116_v58 = vmul.f32 %v1930_v34, %v3318_v63 }
 0x111   :  { %v1353_v52 = vsel %vm3327_vm5, %v1352_v2, %v1348_v44  ;;  %v979_v15 = vmul.f32 %v1924_v23, %v978_v35  ;;  %v1002_v8 = vsub.f32 1.5, %v1001_v20  ;;  %v989_v27 = vmul.f32 0.5, %v988_v16  ;;  %v310_v35 = vpop.f32.mrf.mxu0  ;;  %v423_v20 = vpop.f32.mrf.mxu1 }
 0x112   :  { %v1534_v38 = vmul.f32 %v1353_v52, %v355_v22  ;;  %v1535_v41 = vmul.f32 %v1353_v52, %v468_v6  ;;  %vm729_vm12 = vcmp.eq.f32.partialorder %v2551_v39, inf  ;;  %1931 = vrcp.f32 %v3350_v33 }
 0x113   :  { %v980_v57 = vmul.f32 %v979_v15, %v3246_v32  ;;  %v1003_v7 = vmul.f32 %v1926_v54, %v1002_v8  ;;  %v990_v61 = vsub.f32 1.5, %v989_v27  ;;  %v1117_v19 = vsub.f32 1.0, %v1116_v58 }
 0x114   :  { %v1604_v25 = vmul.f32 %v2748_v21, %v1534_v38  ;;  %v1605_v30 = vmul.f32 %v2771_v24, %v1535_v41  ;;  %vm1121_vm13 = vweird.f32 %v1930_v34  ;;  %v730_v2 = vsel %vm729_vm12, %v2551_v39, %v2698_v48 }
 0x115   :  { %v1004_v23 = vmul.f32 %v1003_v7, %v3253_v36  ;;  %v991_v55 = vmul.f32 %v1928_v0, %v990_v61  ;;  %vm731_vm14 = vcmp.eq.f32.partialorder %v2551_v39, 0.0  ;;  %v996_v54 = vand.u32 2147483648, %v3275_v47  ;;  %vm3374_vm1 = vmor %vm1120_vm11, %vm1121_vm13 }
 0x116   :  { %1668 = vst [vmem:[#allocation2 + $0x160] sm:$0xff] %v1604_v25  ;;  %v1118_v5 = vmul.f32 %v1930_v34, %v1117_v19  ;;  %v732_v4 = vand.u32 2147483648, %v2551_v39  ;;  %vm921_vm15 = vcmp.eq.f32.partialorder %v2959_v18, inf  ;;  %v3370_v13 = vsel %vm981_vm6, %v3246_v32, %v980_v57 }
 0x117   :  { %1669 = vst [vmem:[#allocation2 + $0x168] sm:$0xff] %v1605_v30  ;;  %vm3378_vm2 = vcmp.eq.f32.partialorder %v1124_v12, 8.507059e+37  ;;  %v1127_v10 = vor.u32 1.1754944e-38, %v1126_v40  ;;  %vm1360_vm0 = vweird.f32 %v3350_v33  ;;  %v1364_v49 = vand.u32 2147483647, %v3350_v33 }
 0x118   :  { %v1119_v39 = vadd.f32 %v1930_v34, %v1118_v5  ;;  %v1366_v31 = vand.u32 2147483648, %v3350_v33  ;;  %v733_v43 = vsel %vm731_vm14, %v732_v4, %v730_v2  ;;  %v1932_v22 = vpop.eup %1931  ;;  %v3388_v63 = vsel %vm1005_vm9, %v3253_v36, %v1004_v23  ;;  %v358_v23 = vpop.f32.mrf.mxu2 }
 0x119   :  { %v3391_v6 = vmul.f32 %v991_v55, %v3275_v47  ;;  %1933 = vrcp.f32 %v733_v43  ;;  %v922_v16 = vsel %vm921_vm15, %v2959_v18, %v3272_v56  ;;  %v1356_v12 = vmul.f32 %v1932_v22, %v3350_v33  ;;  %v471_v2 = vpop.f32.mrf.mxu3 }
 0x11a   :  { %v1123_v44 = vsel %vm3374_vm1, %v1930_v34, %v1119_v39  ;;  %v1139_v40 = vand.u32 2147483647, %v733_v43  ;;  %vm923_vm3 = vcmp.eq.f32.partialorder %v2959_v18, 0.0  ;;  %vm1361_vm4 = vweird.f32 %v1932_v22 }
 0x11b   :  { %v1128_v52 = vsel %vm3378_vm2, %v1127_v10, %v1123_v44  ;;  %v924_v15 = vand.u32 2147483648, %v2959_v18  ;;  %vm741_vm5 = vcmp.eq.f32.partialorder %v2585_v3, inf  ;;  %v1357_v38 = vsub.f32 1.0, %v1356_v12  ;;  %vm3417_vm7 = vmor %vm1360_vm0, %vm1361_vm4  ;;  %v313_v12 = vpop.f32.mrf.mxu0 }
 0x11c   :  { %v1504_v8 = vmul.f32 %v1128_v52, %v310_v35  ;;  %v1505_v27 = vmul.f32 %v1128_v52, %v423_v20  ;;  %v1141_v56 = vand.u32 2147483648, %v733_v43  ;;  %v742_v34 = vsel %vm741_vm5, %v2585_v3, %v2768_v62 }
 0x11d   :  { %v3405_v41 = vsel %vm923_vm3, %v924_v15, %v922_v16  ;;  %vm743_vm6 = vcmp.eq.f32.partialorder %v2585_v3, 0.0  ;;  %v744_v58 = vand.u32 2147483648, %v2585_v3  ;;  %v1358_v18 = vmul.f32 %v1932_v22, %v1357_v38 }
 0x11e   :  { %v1574_v57 = vmul.f32 %v2748_v21, %v1504_v8  ;;  %v1575_v7 = vmul.f32 %v2771_v24, %v1505_v27  ;;  %1935 = vrcp.f32 %v3405_v41  ;;  %v1367_v62 = vor.u32 1.1754944e-38, %v1366_v31 }
 0x11f   :  { %v1934_v61 = vpop.eup %1933  ;;  %v1379_v30 = vand.u32 2147483647, %v3405_v41  ;;  %v1381_v3 = vand.u32 2147483648, %v3405_v41  ;;  %v3423_v19 = vsel %vm743_vm6, %v744_v58, %v742_v34  ;;  %v1359_v55 = vadd.f32 %v1932_v22, %v1358_v18  ;;  %v3917_v18 = vld [vmem:[#allocation7_spill] sm:$0xff] }
 0x120   :  { %1638 = vst [vmem:[#allocation2 + $0x70] sm:$0xff] %v1574_v57  ;;  %vm1365_vm8 = vcmp.eq.f32.partialorder %v1364_v49, 8.507059e+37  ;;  %v1131_v5 = vmul.f32 %v1934_v61, %v733_v43  ;;  %1937 = vrcp.f32 %v3423_v19  ;;  %vm1135_vm9 = vweird.f32 %v733_v43 }
 0x121   :  { %1639 = vst [vmem:[#allocation2 + $0x78] sm:$0xff] %v1575_v7  ;;  %vm3426_vm10 = vcmp.eq.f32.partialorder %v1139_v40, 8.507059e+37  ;;  %v1142_v4 = vor.u32 1.1754944e-38, %v1141_v56  ;;  %vm1375_vm11 = vweird.f32 %v3405_v41  ;;  %v1363_v48 = vsel %vm3417_vm7, %v1932_v22, %v1359_v55  ;;  %v426_v40 = vpop.f32.mrf.mxu1 }
 0x122   :  { %v1132_v0 = vsub.f32 1.0, %v1131_v5  ;;  %vm1136_vm12 = vweird.f32 %v1934_v61  ;;  %vm933_vm13 = vcmp.eq.f32.partialorder %v3064_v11, inf  ;;  %v1368_v10 = vsel %vm1365_vm8, %v1367_v62, %v1363_v48  ;;  %v474_v5 = vpop.f32.mrf.mxu3 }
 0x123   :  { %vm3434_vm14 = vcmp.eq.f32.partialorder %v1379_v30, 8.507059e+37  ;;  %v1382_v49 = vor.u32 1.1754944e-38, %v1381_v3  ;;  %v1154_v31 = vand.u32 2147483647, %v3423_v19  ;;  %v934_v35 = vsel %vm933_vm13, %v3064_v11, %v3278_v29  ;;  %vm3443_vm1 = vmor %vm1135_vm9, %vm1136_vm12 }
 0x124   :  { %v1936_v20 = vpop.eup %1935  ;;  %v1536_v16 = vmul.f32 %v1368_v10, %v358_v23  ;;  %v1537_v44 = vmul.f32 %v1368_v10, %v471_v2  ;;  %v1133_v22 = vmul.f32 %v1934_v61, %v1132_v0  ;;  %vm935_vm15 = vcmp.eq.f32.partialorder %v3064_v11, 0.0  ;;  %v361_v2 = vpop.f32.mrf.mxu2 }
 0x125   :  { %v1371_v15 = vmul.f32 %v1936_v20, %v3405_v41  ;;  %vm1150_vm2 = vweird.f32 %v3423_v19  ;;  %v936_v8 = vand.u32 2147483648, %v3064_v11  ;;  %vm753_vm0 = vcmp.eq.f32.partialorder %v2565_v53, inf }
 0x126   :  { %v1938_v29 = vpop.eup %1937  ;;  %v1606_v27 = vmul.f32 %v2748_v21, %v1536_v16  ;;  %v1607_v38 = vmul.f32 %v2771_v24, %v1537_v44  ;;  %v1134_v56 = vadd.f32 %v1934_v61, %v1133_v22  ;;  %v1156_v43 = vand.u32 2147483648, %v3423_v19 }
 0x127   :  { %v1372_v34 = vsub.f32 1.0, %v1371_v15  ;;  %vm1376_vm3 = vweird.f32 %v1936_v20  ;;  %v1146_v58 = vmul.f32 %v1938_v29, %v3423_v19  ;;  %v3455_v57 = vsel %vm935_vm15, %v936_v8, %v934_v35 }
 0x128   :  { %1670 = vst [vmem:[#allocation2 + $0x170] sm:$0xff] %v1606_v27  ;;  %v1138_v11 = vsel %vm3443_vm1, %v1934_v61, %v1134_v56  ;;  %vm3459_vm4 = vcmp.eq.f32.partialorder %v1154_v31, 8.507059e+37  ;;  %1939 = vrcp.f32 %v3455_v57  ;;  %v754_v25 = vsel %vm753_vm0, %v2565_v53, %v3917_v18  ;;  %vm3471_vm6 = vmor %vm1375_vm11, %vm1376_vm3 }
 0x129   :  { %1671 = vst [vmem:[#allocation2 + $0x178] sm:$0xff] %v1607_v38  ;;  %v1143_v62 = vsel %vm3426_vm10, %v1142_v4, %v1138_v11  ;;  %v1373_v30 = vmul.f32 %v1936_v20, %v1372_v34  ;;  %v1147_v3 = vsub.f32 1.0, %v1146_v58  ;;  %vm1151_vm5 = vweird.f32 %v1938_v29  ;;  %v429_v52 = vpop.f32.mrf.mxu1 }
 0x12a   :  { %v1506_v23 = vmul.f32 %v1143_v62, %v313_v12  ;;  %v1507_v55 = vmul.f32 %v1143_v62, %v426_v40  ;;  %v1394_v48 = vand.u32 2147483647, %v3455_v57  ;;  %vm755_vm7 = vcmp.eq.f32.partialorder %v2565_v53, 0.0  ;;  %vm3482_vm8 = vmor %vm1150_vm2, %vm1151_vm5  ;;  %v316_v40 = vpop.f32.mrf.mxu0 }
 0x12b   :  { %v1374_v33 = vadd.f32 %v1936_v20, %v1373_v30  ;;  %v1148_v4 = vmul.f32 %v1938_v29, %v1147_v3  ;;  %v1157_v0 = vor.u32 1.1754944e-38, %v1156_v43  ;;  %v756_v10 = vand.u32 2147483648, %v2565_v53  ;;  %v3925_v3 = vld [vmem:[#allocation8_spill] sm:$0xff] }
 0x12c   :  { %v1576_v31 = vmul.f32 %v2748_v21, %v1506_v23  ;;  %v1577_v35 = vmul.f32 %v2771_v24, %v1507_v55  ;;  %vm1390_vm9 = vweird.f32 %v3455_v57  ;;  %v1396_v16 = vand.u32 2147483648, %v3455_v57  ;;  %v364_v55 = vpop.f32.mrf.mxu2 }
 0x12d   :  { %v1378_v44 = vsel %vm3471_vm6, %v1936_v20, %v1374_v33  ;;  %v1149_v12 = vadd.f32 %v1938_v29, %v1148_v4  ;;  %v3490_v22 = vsel %vm755_vm7, %v756_v10, %v754_v25  ;;  %vm945_vm10 = vcmp.eq.f32.partialorder %v3136_v1, inf  ;;  %v3924_v25 = vld [vmem:[#allocation5_spill] sm:$0xff] }
 0x12e   :  { %v1940_v53 = vpop.eup %1939  ;;  %1640 = vst [vmem:[#allocation2 + $0x80] sm:$0xff] %v1576_v31  ;;  %v1383_v19 = vsel %vm3434_vm14, %v1382_v49, %v1378_v44  ;;  %vm3495_vm11 = vcmp.eq.f32.partialorder %v1394_v48, 8.507059e+37  ;;  %1941 = vrcp.f32 %v3490_v22  ;;  %vm947_vm12 = vcmp.eq.f32.partialorder %v3136_v1, 0.0 }
 0x12f   :  { %1641 = vst [vmem:[#allocation2 + $0x88] sm:$0xff] %v1577_v35  ;;  %v1538_v20 = vmul.f32 %v1383_v19, %v361_v2  ;;  %v1539_v8 = vmul.f32 %v1383_v19, %v474_v5  ;;  %v1153_v27 = vsel %vm3482_vm8, %v1938_v29, %v1149_v12  ;;  %v1386_v38 = vmul.f32 %v1940_v53, %v3455_v57  ;;  %v477_v5 = vpop.f32.mrf.mxu3 }
 0x130   :  { %v1158_v39 = vsel %vm3459_vm4, %v1157_v0, %v1153_v27  ;;  %vm1391_vm13 = vweird.f32 %v1940_v53  ;;  %v1169_v49 = vand.u32 2147483647, %v3490_v22  ;;  %v946_v56 = vsel %vm945_vm10, %v3136_v1, %v3294_v42 }
 0x131   :  { %v1608_v43 = vmul.f32 %v2748_v21, %v1538_v20  ;;  %v1609_v34 = vmul.f32 %v2771_v24, %v1539_v8  ;;  %v1508_v58 = vmul.f32 %v1158_v39, %v316_v40  ;;  %v1509_v11 = vmul.f32 %v1158_v39, %v429_v52  ;;  %vm3529_vm1 = vmor %vm1390_vm9, %vm1391_vm13 }
 0x132   :  { %v1387_v29 = vsub.f32 1.0, %v1386_v38  ;;  %v1171_v18 = vand.u32 2147483648, %v3490_v22  ;;  %v948_v7 = vand.u32 2147483648, %v3136_v1  ;;  %vm765_vm14 = vcmp.eq.f32.partialorder %v3924_v25, inf  ;;  %v319_v15 = vpop.f32.mrf.mxu0 }
 0x133   :  { %1672 = vst [vmem:[#allocation2 + $0x180] sm:$0xff] %v1608_v43  ;;  %v1578_v62 = vmul.f32 %v2748_v21, %v1508_v58  ;;  %v1579_v30 = vmul.f32 %v2771_v24, %v1509_v11  ;;  %v766_v42 = vsel %vm765_vm14, %v3924_v25, %v3925_v3  ;;  %vm767_vm15 = vcmp.eq.f32.partialorder %v3924_v25, 0.0 }
 0x134   :  { %v1942_v23 = vpop.eup %1941  ;;  %1673 = vst [vmem:[#allocation2 + $0x188] sm:$0xff] %v1609_v34  ;;  %v1388_v2 = vmul.f32 %v1940_v53, %v1387_v29  ;;  %v1397_v61 = vor.u32 1.1754944e-38, %v1396_v16  ;;  %v3523_v48 = vsel %vm947_vm12, %v948_v7, %v946_v56  ;;  %v768_v33 = vand.u32 2147483648, %v3924_v25  ;;  %v367_v7 = vpop.f32.mrf.mxu2 }
 0x135   :  { %1642 = vst [vmem:[#allocation2 + $0x90] sm:$0xff] %v1578_v62  ;;  %v1161_v0 = vmul.f32 %v1942_v23, %v3490_v22  ;;  %vm1165_vm2 = vweird.f32 %v3490_v22  ;;  %vm3535_vm0 = vcmp.eq.f32.partialorder %v1169_v49, 8.507059e+37  ;;  %1943 = vrcp.f32 %v3523_v48  ;;  %v432_v49 = vpop.f32.mrf.mxu1 }
 0x136   :  { %1643 = vst [vmem:[#allocation2 + $0x98] sm:$0xff] %v1579_v30  ;;  %v1389_v1 = vadd.f32 %v1940_v53, %v1388_v2  ;;  %v1172_v31 = vor.u32 1.1754944e-38, %v1171_v18  ;;  %v1411_v35 = vand.u32 2147483648, %v3523_v48  ;;  %v3543_v57 = vsel %vm767_vm15, %v768_v33, %v766_v42 }
 0x137   :  { %vm993_vm3 = vcmp.eq.f32.partialorder %v3275_v47, inf  ;;  %v1162_v41 = vsub.f32 1.0, %v1161_v0  ;;  %vm1166_vm4 = vweird.f32 %v1942_v23  ;;  %1945 = vrcp.f32 %v3543_v57  ;;  %v480_v62 = vpop.f32.mrf.mxu3 }
 0x138   :  { %vm957_vm5 = vcmp.eq.f32.partialorder %v3158_v17, inf  ;;  %v1393_v16 = vsel %vm3529_vm1, %v1940_v53, %v1389_v1  ;;  %vm1405_vm6 = vweird.f32 %v3523_v48  ;;  %v1409_v44 = vand.u32 2147483647, %v3523_v48  ;;  %vm3558_vm8 = vmor %vm1165_vm2, %vm1166_vm4 }
 0x139   :  { %vm1180_vm7 = vweird.f32 %v3543_v57  ;;  %v1398_v12 = vsel %vm3495_vm11, %v1397_v61, %v1393_v16  ;;  %v1163_v19 = vmul.f32 %v1942_v23, %v1162_v41  ;;  %v1412_v40 = vor.u32 1.1754944e-38, %v1411_v35 }
 0x13a   :  { %v1184_v52 = vand.u32 2147483647, %v3543_v57  ;;  %v1540_v20 = vmul.f32 %v1398_v12, %v364_v55  ;;  %v1541_v8 = vmul.f32 %v1398_v12, %v477_v5  ;;  %v958_v53 = vsel %vm957_vm5, %v3158_v17, %v3321_v51  ;;  %v322_v12 = vpop.f32.mrf.mxu0 }
 0x13b   :  { %vm959_vm9 = vcmp.eq.f32.partialorder %v3158_v17, 0.0  ;;  %v1944_v38 = vpop.eup %1943  ;;  %v1164_v39 = vadd.f32 %v1942_v23, %v1163_v19  ;;  %v1186_v56 = vand.u32 2147483648, %v3543_v57  ;;  %v960_v43 = vand.u32 2147483648, %v3158_v17 }
 0x13c   :  { %vm777_vm10 = vcmp.eq.f32.partialorder %v2628_v28, inf  ;;  %v1610_v22 = vmul.f32 %v2748_v21, %v1540_v20  ;;  %v1611_v34 = vmul.f32 %v2771_v24, %v1541_v8  ;;  %v1401_v58 = vmul.f32 %v1944_v38, %v3523_v48 }
 0x13d   :  { %vm779_vm11 = vcmp.eq.f32.partialorder %v2628_v28, 0.0  ;;  %v1946_v51 = vpop.eup %1945  ;;  %v1168_v11 = vsel %vm3558_vm8, %v1942_v23, %v1164_v39  ;;  %vm1406_vm12 = vweird.f32 %v1944_v38  ;;  %v3574_v29 = vsel %vm959_vm9, %v960_v43, %v958_v53  ;;  %v435_v19 = vpop.f32.mrf.mxu1 }
 0x13e   :  { %v780_v18 = vand.u32 2147483648, %v2628_v28  ;;  %1674 = vst [vmem:[#allocation2 + $0x190] sm:$0xff] %v1610_v22  ;;  %v1173_v17 = vsel %vm3535_vm0, %v1172_v31, %v1168_v11  ;;  %v1402_v25 = vsub.f32 1.0, %v1401_v58  ;;  %v1176_v30 = vmul.f32 %v1946_v51, %v3543_v57  ;;  %vm3593_vm15 = vmor %vm1405_vm6, %vm1406_vm12 }
 0x13f   :  { %v778_v3 = vsel %vm777_vm10, %v2628_v28, %v3261_v59  ;;  %1675 = vst [vmem:[#allocation2 + $0x198] sm:$0xff] %v1611_v34  ;;  %v1510_v42 = vmul.f32 %v1173_v17, %v319_v15  ;;  %v1511_v23 = vmul.f32 %v1173_v17, %v432_v49  ;;  %vm1181_vm13 = vweird.f32 %v1946_v51  ;;  %v3940_v49 = vld [vmem:[#allocation6_spill] sm:$0xff]  ;;  %v370_v34 = vpop.f32.mrf.mxu2  ;;  %v483_v58 = vpop.f32.mrf.mxu3 }
 0x140   :  { %1947 = vrcp.f32 %v3574_v29  ;;  %v1403_v55 = vmul.f32 %v1944_v38, %v1402_v25  ;;  %v1177_v2 = vsub.f32 1.0, %v1176_v30  ;;  %v1424_v61 = vand.u32 2147483647, %v3574_v29  ;;  %vm3611_vm0 = vmor %vm1180_vm7, %vm1181_vm13 }
 0x141   :  { %v1426_v5 = vand.u32 2147483648, %v3574_v29  ;;  %vm983_vm14 = vcmp.eq.f32.partialorder %v3246_v32, 0.0  ;;  %v1580_v33 = vmul.f32 %v2748_v21, %v1510_v42  ;;  %v1581_v4 = vmul.f32 %v2771_v24, %v1511_v23  ;;  %v3941_v42 = vld [vmem:[#allocation9_spill] sm:$0xff] }
 0x142   :  { %v3599_v0 = vsel %vm779_vm11, %v780_v18, %v778_v3  ;;  %vm969_vm1 = vcmp.eq.f32.partialorder %v3141_v60, inf  ;;  %v3606_v10 = vsel %vm993_vm3, %v3275_v47, %v3391_v6  ;;  %v1404_v1 = vadd.f32 %v1944_v38, %v1403_v55 }
 0x143   :  { %vm1410_vm2 = vcmp.eq.f32.partialorder %v1409_v44, 8.507059e+37  ;;  %v1178_v31 = vmul.f32 %v1946_v51, %v1177_v2  ;;  %1644 = vst [vmem:[#allocation2 + $0xa0] sm:$0xff] %v1580_v33  ;;  %vm3615_vm4 = vcmp.eq.f32.partialorder %v1184_v52, 8.507059e+37  ;;  %v1187_v35 = vor.u32 1.1754944e-38, %v1186_v56 }
 0x144   :  { %vm1420_vm5 = vweird.f32 %v3574_v29  ;;  %1949 = vrcp.f32 %v3599_v0  ;;  %1645 = vst [vmem:[#allocation2 + $0xa8] sm:$0xff] %v1581_v4  ;;  %v1408_v6 = vsel %vm3593_vm15, %v1944_v38, %v1404_v1  ;;  %v970_v57 = vsel %vm969_vm1, %v3141_v60, %v3297_v26 }
 0x145   :  { %v1179_v41 = vadd.f32 %v1946_v51, %v1178_v31  ;;  %vm971_vm3 = vcmp.eq.f32.partialorder %v3141_v60, 0.0  ;;  %v1413_v44 = vsel %vm1410_vm2, %v1412_v40, %v1408_v6  ;;  %vm3626_vm6 = vcmp.eq.f32.partialorder %v1424_v61, 8.507059e+37 }
 0x146   :  { %v1948_v16 = vpop.eup %1947  ;;  %v1427_v20 = vor.u32 1.1754944e-38, %v1426_v5  ;;  %vm1195_vm7 = vweird.f32 %v3599_v0  ;;  %v972_v8 = vand.u32 2147483648, %v3141_v60  ;;  %v1542_v27 = vmul.f32 %v1413_v44, %v367_v7 }
 0x147   :  { %v1543_v53 = vmul.f32 %v1413_v44, %v480_v62  ;;  %v1183_v26 = vsel %vm3611_vm0, %v1946_v51, %v1179_v41  ;;  %v1416_v38 = vmul.f32 %v1948_v16, %v3574_v29  ;;  %v1199_v15 = vand.u32 2147483647, %v3599_v0  ;;  %v438_v44 = vpop.f32.mrf.mxu1  ;;  %v486_v52 = vpop.f32.mrf.mxu3 }
 0x148   :  { %v1188_v40 = vsel %vm3615_vm4, %v1187_v35, %v1183_v26  ;;  %v3638_v39 = vsel %vm971_vm3, %v972_v8, %v970_v57  ;;  %vm789_vm8 = vcmp.eq.f32.partialorder %v3940_v49, inf  ;;  %v1612_v56 = vmul.f32 %v2748_v21, %v1542_v27  ;;  %v373_v8 = vpop.f32.mrf.mxu2 }
 0x149   :  { %v1613_v60 = vmul.f32 %v2771_v24, %v1543_v53  ;;  %v1512_v43 = vmul.f32 %v1188_v40, %v322_v12  ;;  %v1513_v22 = vmul.f32 %v1188_v40, %v435_v19  ;;  %v1417_v11 = vsub.f32 1.0, %v1416_v38 }
 0x14a   :  { %v1950_v51 = vpop.eup %1949  ;;  %vm1421_vm9 = vweird.f32 %v1948_v16  ;;  %v1201_v18 = vand.u32 2147483648, %v3599_v0  ;;  %1951 = vrcp.f32 %v3638_v39  ;;  %1676 = vst [vmem:[#allocation2 + $0x1a0] sm:$0xff] %v1612_v56  ;;  %v1439_v62 = vand.u32 2147483647, %v3638_v39 }
 0x14b   :  { %v1582_v17 = vmul.f32 %v2748_v21, %v1512_v43  ;;  %v1583_v7 = vmul.f32 %v2771_v24, %v1513_v22  ;;  %v1191_v25 = vmul.f32 %v1950_v51, %v3599_v0  ;;  %1677 = vst [vmem:[#allocation2 + $0x1a8] sm:$0xff] %v1613_v60  ;;  %v1418_v30 = vmul.f32 %v1948_v16, %v1417_v11  ;;  %vm3658_vm12 = vmor %vm1420_vm5, %vm1421_vm9  ;;  %v325_v0 = vpop.f32.mrf.mxu0 }
 0x14c   :  { %vm1196_vm10 = vweird.f32 %v1950_v51  ;;  %v1441_v3 = vand.u32 2147483648, %v3638_v39  ;;  %v790_v23 = vsel %vm789_vm8, %v3940_v49, %v3941_v42  ;;  %vm995_vm11 = vcmp.eq.f32.partialorder %v3275_v47, 0.0 }
 0x14d   :  { %1646 = vst [vmem:[#allocation2 + $0xb0] sm:$0xff] %v1582_v17  ;;  %v1192_v2 = vsub.f32 1.0, %v1191_v25  ;;  %vm791_vm13 = vcmp.eq.f32.partialorder %v3940_v49, 0.0  ;;  %v792_v61 = vand.u32 2147483648, %v3940_v49  ;;  %v3669_v5 = vsel %vm983_vm14, %v984_v45, %v3370_v13  ;;  %vm3688_vm14 = vmor %vm1195_vm7, %vm1196_vm10 }
 0x14e   :  { %1647 = vst [vmem:[#allocation2 + $0xb8] sm:$0xff] %v1583_v7  ;;  %v1419_v33 = vadd.f32 %v1948_v16, %v1418_v30  ;;  %vm3671_vm15 = vcmp.eq.f32.partialorder %v1199_v15, 8.507059e+37  ;;  %v1202_v4 = vor.u32 1.1754944e-38, %v1201_v18  ;;  %1953 = vrcp.f32 %v3669_v5 }
 0x14f   :  { %v1193_v59 = vmul.f32 %v1950_v51, %v1192_v2  ;;  %vm1435_vm1 = vweird.f32 %v3638_v39  ;;  %vm3677_vm2 = vcmp.eq.f32.partialorder %v1439_v62, 8.507059e+37  ;;  %v3681_v31 = vsel %vm791_vm13, %v792_v61, %v790_v23  ;;  %v441_v13 = vpop.f32.mrf.mxu1 }
 0x150   :  { %v1952_v32 = vpop.eup %1951  ;;  %v1423_v45 = vsel %vm3658_vm12, %v1948_v16, %v1419_v33  ;;  %v1442_v48 = vor.u32 1.1754944e-38, %v1441_v3  ;;  %1955 = vrcp.f32 %v3681_v31  ;;  %vm1450_vm0 = vweird.f32 %v3669_v5  ;;  %v376_v1 = vpop.f32.mrf.mxu2 }
 0x151   :  { %v1428_v28 = vsel %vm3626_vm6, %v1427_v20, %v1423_v45  ;;  %v1194_v35 = vadd.f32 %v1950_v51, %v1193_v59  ;;  %v1431_v6 = vmul.f32 %v1952_v32, %v3638_v39  ;;  %v1454_v41 = vand.u32 2147483647, %v3669_v5 }
 0x152   :  { %v1544_v57 = vmul.f32 %v1428_v28, %v370_v34  ;;  %v1545_v16 = vmul.f32 %v1428_v28, %v483_v58  ;;  %vm1210_vm4 = vweird.f32 %v3681_v31  ;;  %v1456_v12 = vand.u32 2147483648, %v3669_v5 }
 0x153   :  { %v1198_v19 = vsel %vm3688_vm14, %v1950_v51, %v1194_v35  ;;  %v1432_v27 = vsub.f32 1.0, %v1431_v6  ;;  %vm1436_vm5 = vweird.f32 %v1952_v32  ;;  %v1214_v20 = vand.u32 2147483647, %v3681_v31  ;;  %v328_v45 = vpop.f32.mrf.mxu0 }
 0x154   :  { %v3703_v53 = vpop.eup %1953  ;;  %v1614_v26 = vmul.f32 %v2748_v21, %v1544_v57  ;;  %v1615_v38 = vmul.f32 %v2771_v24, %v1545_v16  ;;  %v1203_v40 = vsel %vm3671_vm15, %v1202_v4, %v1198_v19  ;;  %v1216_v15 = vand.u32 2147483648, %v3681_v31  ;;  %vm3714_vm3 = vmor %vm1435_vm1, %vm1436_vm5 }
 0x155   :  { %v1514_v49 = vmul.f32 %v1203_v40, %v325_v0  ;;  %v1515_v56 = vmul.f32 %v1203_v40, %v438_v44  ;;  %v1433_v60 = vmul.f32 %v1952_v32, %v1432_v27  ;;  %v1446_v43 = vmul.f32 %v3703_v53, %v3669_v5 }
 0x156   :  { %v1956_v22 = vpop.eup %1955  ;;  %1678 = vst [vmem:[#allocation2 + $0x1b0] sm:$0xff] %v1614_v26  ;;  %vm1451_vm6 = vweird.f32 %v3703_v53  ;;  %vm801_vm7 = vcmp.eq.f32.partialorder %v2626_v50, inf  ;;  %vm803_vm8 = vcmp.eq.f32.partialorder %v2626_v50, 0.0  ;;  %v804_v58 = vand.u32 2147483648, %v2626_v50 }
 0x157   :  { %1679 = vst [vmem:[#allocation2 + $0x1b8] sm:$0xff] %v1615_v38  ;;  %v1584_v51 = vmul.f32 %v2748_v21, %v1514_v49  ;;  %v1585_v11 = vmul.f32 %v2771_v24, %v1515_v56  ;;  %v1434_v18 = vadd.f32 %v1952_v32, %v1433_v60  ;;  %v1206_v39 = vmul.f32 %v1956_v22, %v3681_v31  ;;  %v489_v31 = vpop.f32.mrf.mxu3 }
 0x158   :  { %vm1211_vm9 = vweird.f32 %v1956_v22  ;;  %v1447_v17 = vsub.f32 1.0, %v1446_v43  ;;  %v802_v7 = vsel %vm801_vm7, %v2626_v50, %v3257_v14  ;;  %v3732_v25 = vsel %vm995_vm11, %v996_v54, %v3606_v10  ;;  %vm3752_vm11 = vmor %vm1450_vm0, %vm1451_vm6 }
 0x159   :  { %vm1007_vm10 = vcmp.eq.f32.partialorder %v3253_v36, 0.0  ;;  %1648 = vst [vmem:[#allocation2 + $0xc0] sm:$0xff] %v1584_v51  ;;  %v1438_v62 = vsel %vm3714_vm3, %v1952_v32, %v1434_v18  ;;  %v1207_v30 = vsub.f32 1.0, %v1206_v39  ;;  %v3737_v3 = vsel %vm803_vm8, %v804_v58, %v802_v7  ;;  %vm3759_vm13 = vmor %vm1210_vm4, %vm1211_vm9  ;;  %v379_v18 = vpop.f32.mrf.mxu2  ;;  %v444_v7 = vpop.f32.mrf.mxu1 }
 0x15a   :  { %1957 = vrcp.f32 %v3732_v25  ;;  %1649 = vst [vmem:[#allocation2 + $0xc8] sm:$0xff] %v1585_v11  ;;  %v1443_v50 = vsel %vm3677_vm2, %v1442_v48, %v1438_v62  ;;  %vm3742_vm12 = vcmp.eq.f32.partialorder %v1214_v20, 8.507059e+37  ;;  %v1448_v47 = vmul.f32 %v3703_v53, %v1447_v17 }
 0x15b   :  { %1959 = vrcp.f32 %v3737_v3  ;;  %v1546_v54 = vmul.f32 %v1443_v50, %v373_v8  ;;  %v1547_v10 = vmul.f32 %v1443_v50, %v486_v52  ;;  %v1208_v42 = vmul.f32 %v1956_v22, %v1207_v30  ;;  %v331_v17 = vpop.f32.mrf.mxu0 }
 0x15c   :  { %v1457_v55 = vor.u32 1.1754944e-38, %v1456_v12  ;;  %v1217_v61 = vor.u32 1.1754944e-38, %v1216_v15  ;;  %v1449_v33 = vadd.f32 %v3703_v53, %v1448_v47  ;;  %vm3764_vm15 = vcmp.eq.f32.partialorder %v1454_v41, 8.507059e+37 }
 0x15d   :  { %vm1225_vm1 = vweird.f32 %v3737_v3  ;;  %v1616_v5 = vmul.f32 %v2748_v21, %v1546_v54  ;;  %v1617_v4 = vmul.f32 %v2771_v24, %v1547_v10  ;;  %v1209_v59 = vadd.f32 %v1956_v22, %v1208_v42 }
 0x15e   :  { %v1229_v32 = vand.u32 2147483647, %v3737_v3  ;;  %v1453_v48 = vsel %vm3752_vm11, %v3703_v53, %v1449_v33  ;;  %v1231_v28 = vand.u32 2147483648, %v3737_v3  ;;  %vm1465_vm2 = vweird.f32 %v3732_v25 }
 0x15f   :  { %v1469_v35 = vand.u32 2147483647, %v3732_v25  ;;  %1680 = vst [vmem:[#allocation2 + $0x1c0] sm:$0xff] %v1616_v5  ;;  %v1213_v41 = vsel %vm3759_vm13, %v1956_v22, %v1209_v59  ;;  %v1458_v57 = vsel %vm3764_vm15, %v1457_v55, %v1453_v48  ;;  %v1471_v16 = vand.u32 2147483648, %v3732_v25  ;;  %v492_v39 = vpop.f32.mrf.mxu3 }
 0x160   :  { %v1958_v6 = vpop.eup %1957  ;;  %vm813_vm14 = vcmp.eq.f32.partialorder %v2685_v37, inf  ;;  %1681 = vst [vmem:[#allocation2 + $0x1c8] sm:$0xff] %v1617_v4  ;;  %v1218_v44 = vsel %vm3742_vm12, %v1217_v61, %v1213_v41  ;;  %v1548_v12 = vmul.f32 %v1458_v57, %v376_v1  ;;  %v1549_v19 = vmul.f32 %v1458_v57, %v489_v31 }
 0x161   :  { %v1960_v0 = vpop.eup %1959  ;;  %v1461_v8 = vmul.f32 %v1958_v6, %v3732_v25  ;;  %v1516_v27 = vmul.f32 %v1218_v44, %v328_v45  ;;  %v1517_v52 = vmul.f32 %v1218_v44, %v441_v13  ;;  %vm815_vm0 = vcmp.eq.f32.partialorder %v2685_v37, 0.0 }
 0x162   :  { %v1221_v20 = vmul.f32 %v1960_v0, %v3737_v3  ;;  %v1618_v53 = vmul.f32 %v2748_v21, %v1548_v12  ;;  %vm1226_vm4 = vweird.f32 %v1960_v0  ;;  %vm1466_vm5 = vweird.f32 %v1958_v6 }
 0x163   :  { %v1462_v26 = vsub.f32 1.0, %v1461_v8  ;;  %v1586_v38 = vmul.f32 %v2748_v21, %v1516_v27  ;;  %v1587_v40 = vmul.f32 %v2771_v24, %v1517_v52  ;;  %v1619_v15 = vmul.f32 %v2771_v24, %v1549_v19  ;;  %vm3805_vm3 = vmor %vm1465_vm2, %vm1466_vm5 }
 0x164   :  { %v1222_v49 = vsub.f32 1.0, %v1221_v20  ;;  %1682 = vst [vmem:[#allocation2 + $0x1d0] sm:$0xff] %v1618_v53  ;;  %v814_v60 = vsel %vm813_vm14, %v2685_v37, %v3266_v9  ;;  %v816_v43 = vand.u32 2147483648, %v2685_v37  ;;  %v1009_v22 = vsel %vm1007_vm10, %v1008_v46, %v3388_v63  ;;  %vm3812_vm6 = vmor %vm1225_vm1, %vm1226_vm4 }
 0x165   :  { %v1463_v56 = vmul.f32 %v1958_v6, %v1462_v26  ;;  %1650 = vst [vmem:[#allocation2 + $0xd0] sm:$0xff] %v1586_v38  ;;  %v1472_v51 = vor.u32 1.1754944e-38, %v1471_v16  ;;  %1961 = vrcp.f32 %v1009_v22  ;;  %v1232_v36 = vor.u32 1.1754944e-38, %v1231_v28  ;;  %v334_v16 = vpop.f32.mrf.mxu0 }
 0x166   :  { %v1223_v34 = vmul.f32 %v1960_v0, %v1222_v49  ;;  %1651 = vst [vmem:[#allocation2 + $0xd8] sm:$0xff] %v1587_v40  ;;  %vm1470_vm7 = vcmp.eq.f32.partialorder %v1469_v35, 8.507059e+37  ;;  %v817_v63 = vsel %vm815_vm0, %v816_v43, %v814_v60  ;;  %vm1230_vm8 = vcmp.eq.f32.partialorder %v1229_v32, 8.507059e+37  ;;  %v382_v35 = vpop.f32.mrf.mxu2 }
 0x167   :  { %v1464_v46 = vadd.f32 %v1958_v6, %v1463_v56  ;;  %1683 = vst [vmem:[#allocation2 + $0x1d8] sm:$0xff] %v1619_v15  ;;  %1963 = vrcp.f32 %v817_v63  ;;  %vm1480_vm9 = vweird.f32 %v1009_v22  ;;  %v1486_v33 = vand.u32 2147483648, %v1009_v22 }
 0x168   :  { %v1224_v11 = vadd.f32 %v1960_v0, %v1223_v34  ;;  %v1484_v4 = vand.u32 2147483647, %v1009_v22  ;;  %vm1240_vm12 = vweird.f32 %v817_v63  ;;  %v1246_v59 = vand.u32 2147483648, %v817_v63 }
 0x169   :  { %v1468_v25 = vsel %vm3805_vm3, %v1958_v6, %v1464_v46  ;;  %v1244_v31 = vand.u32 2147483647, %v817_v63  ;;  %v1487_v45 = vor.u32 1.1754944e-38, %v1486_v33  ;;  %v495_v6 = vpop.f32.mrf.mxu3 }
 0x16a   :  { %v1228_v62 = vsel %vm3812_vm6, %v1960_v0, %v1224_v11  ;;  %v1473_v30 = vsel %vm1470_vm7, %v1472_v51, %v1468_v25  ;;  %vm1485_vm15 = vcmp.eq.f32.partialorder %v1484_v4, 8.507059e+37  ;;  %v1247_v28 = vor.u32 1.1754944e-38, %v1246_v59  ;;  %v447_v0 = vpop.f32.mrf.mxu1 }
 0x16b   :  { %v1233_v3 = vsel %vm1230_vm8, %v1232_v36, %v1228_v62  ;;  %v1550_v50 = vmul.f32 %v1473_v30, %v379_v18  ;;  %v1551_v14 = vmul.f32 %v1473_v30, %v492_v39  ;;  %v1962_v37 = vpop.eup %1961  ;;  %vm1245_vm2 = vcmp.eq.f32.partialorder %v1244_v31, 8.507059e+37 }
 0x16c   :  { %v1518_v47 = vmul.f32 %v1233_v3, %v331_v17  ;;  %v1519_v54 = vmul.f32 %v1233_v3, %v444_v7  ;;  %v1476_v42 = vmul.f32 %v1962_v37, %v1009_v22  ;;  %vm1481_vm10 = vweird.f32 %v1962_v37 }
 0x16d   :  { %v1620_v10 = vmul.f32 %v2748_v21, %v1550_v50  ;;  %v1964_v23 = vpop.eup %1963  ;;  %v1621_v61 = vmul.f32 %v2771_v24, %v1551_v14  ;;  %vm1482_vm13 = vmor %vm1480_vm9, %vm1481_vm10 }
 0x16e   :  { %v1588_v55 = vmul.f32 %v2748_v21, %v1518_v47  ;;  %v1589_v2 = vmul.f32 %v2771_v24, %v1519_v54  ;;  %v1236_v29 = vmul.f32 %v1964_v23, %v817_v63  ;;  %v1477_v5 = vsub.f32 1.0, %v1476_v42 }
 0x16f   :  { %1684 = vst [vmem:[#allocation2 + $0x1e0] sm:$0xff] %v1620_v10  ;;  %vm1241_vm11 = vweird.f32 %v1964_v23 }
 0x170   :  { %1652 = vst [vmem:[#allocation2 + $0xe0] sm:$0xff] %v1588_v55  ;;  %v1237_v1 = vsub.f32 1.0, %v1236_v29  ;;  %v1478_v32 = vmul.f32 %v1962_v37, %v1477_v5  ;;  %vm1242_vm1 = vmor %vm1240_vm12, %vm1241_vm11 }
 0x171   :  { %1653 = vst [vmem:[#allocation2 + $0xe8] sm:$0xff] %v1589_v2 }
 0x172   :  { %1685 = vst [vmem:[#allocation2 + $0x1e8] sm:$0xff] %v1621_v61  ;;  %v1238_v13 = vmul.f32 %v1964_v23, %v1237_v1  ;;  %v1479_v48 = vadd.f32 %v1962_v37, %v1478_v32 }
 0x174   :  { %v1239_v41 = vadd.f32 %v1964_v23, %v1238_v13  ;;  %v1483_v57 = vsel %vm1482_vm13, %v1962_v37, %v1479_v48 }
 0x175   :  { %v1488_v44 = vsel %vm1485_vm15, %v1487_v45, %v1483_v57 }
 0x176   :  { %v1243_v12 = vsel %vm1242_vm1, %v1964_v23, %v1239_v41  ;;  %v1552_v19 = vmul.f32 %v1488_v44, %v382_v35  ;;  %v1553_v8 = vmul.f32 %v1488_v44, %v495_v6 }
 0x177   :  { %v1248_v27 = vsel %vm1245_vm2, %v1247_v28, %v1243_v12 }
 0x178   :  { %v1520_v52 = vmul.f32 %v1248_v27, %v334_v16  ;;  %v1521_v20 = vmul.f32 %v1248_v27, %v447_v0  ;;  %v1622_v53 = vmul.f32 %v2748_v21, %v1552_v19  ;;  %v1623_v26 = vmul.f32 %v2771_v24, %v1553_v8 }
 0x17a   :  { %v1590_v38 = vmul.f32 %v2748_v21, %v1520_v52  ;;  %v1591_v40 = vmul.f32 %v2771_v24, %v1521_v20  ;;  %1686 = vst [vmem:[#allocation2 + $0x1f0] sm:$0xff] %v1622_v53 }
 0x17b   :  { %1687 = vst [vmem:[#allocation2 + $0x1f8] sm:$0xff] %v1623_v26 }
 0x17c   :  { %1654 = vst [vmem:[#allocation2 + $0xf0] sm:$0xff] %v1590_v38 }
 0x17d   :  { %1655 = vst [vmem:[#allocation2 + $0xf8] sm:$0xff] %v1591_v40 }
 0x17e   :  { %1700 = dma.vmem_to_hbm [thread:$0]  %s1693_s5, 8192, %s1695_s8, [#allocation3], %s1992_s9, %s1992_s9, %s1993_s10  }
 0x17f   :  { %1989 = dma.done.wait [#allocation3], 8192  }
 0x180   :  { %1990 = vsyncadd [#allocation3], 4294959104 }
 0x181   :  { %1705 = vsyncpa [#allocation3], 1 }

</bundles_post_ra>
